<compile_context>
chip_gen: v5e
topology: v5e:2x2
jax: 0.10.0
libtpu: 0.0.40
codegen_flags: <defaults>
</compile_context>

<pallas_src>
import functools

import jax
import jax.numpy as jnp
from jax.experimental import pallas as pl
from jax.experimental.pallas import tpu as pltpu

IN_DIM, H_DIM, OUT_DIM = 784, 200, 10
IN_PAD, H_PAD, OUT_PAD = 896, 256, 128   # lane-aligned (multiples of 128)


def _round_up(n, m):
    return ((n + m - 1) // m) * m


def mlp_kernel(x_ref, w1_ref, b1_ref, w2_ref, b2_ref, w3_ref, b3_ref,
               *rest, use_dropout):
    if use_dropout:
        m1_ref, m2_ref, o_ref = rest
    else:
        (o_ref,) = rest

    # fc1 + relu   (x is already bf16; accumulate in f32 on the MXU)
    h = jnp.dot(x_ref[...], w1_ref[...], preferred_element_type=jnp.float32)
    h = jnp.maximum(h + b1_ref[...], 0.0)
    if use_dropout:
        h = h * m1_ref[...]          # pre-scaled inverted-dropout mask (f32)

    # fc2 + relu
    h = jnp.dot(h.astype(jnp.bfloat16), w2_ref[...],
                preferred_element_type=jnp.float32)
    h = jnp.maximum(h + b2_ref[...], 0.0)
    if use_dropout:
        h = h * m2_ref[...]

    # fc3 (no activation), lane-dense 128-wide output block
    o = jnp.dot(h.astype(jnp.bfloat16), w3_ref[...],
                preferred_element_type=jnp.float32) + b3_ref[...]
    o_ref[...] = o.astype(o_ref.dtype)


def _pad2(a, rows, cols):
    return jnp.pad(a, ((0, rows - a.shape[0]), (0, cols - a.shape[1])))


def _make_dropout_masks(key, p, rows):
    """Two pre-scaled inverted-dropout masks of shape (rows, H_PAD), f32."""
    k1, k2 = jax.random.split(key)
    if p >= 1.0:
        z = jnp.zeros((rows, H_PAD), jnp.float32)
        return z, z
    scale = 1.0 / (1.0 - p)
    m1 = jax.random.bernoulli(k1, 1.0 - p, (rows, H_PAD)).astype(jnp.float32) * scale
    m2 = jax.random.bernoulli(k2, 1.0 - p, (rows, H_PAD)).astype(jnp.float32) * scale
    return m1, m2


def mnist_2nn_forward(x, params, *, dropout_prob=0.0, training=False, key=None,
                      block_b=512):
    """x: (B, 784) float32. params: (w1,b1,w2,b2,w3,b3) with w as (in, out).
    Returns logits (B, 10) float32."""
    w1, b1, w2, b2, w3, b3 = params
    B = x.shape[0]
    use_dropout = bool(training) and float(dropout_prob) > 0.0

    # Batch tiling: big tiles, padded to a multiple of the tile size.
    bb = min(int(block_b), _round_up(B, 8))
    bb = _round_up(bb, 8)
    Bp = _round_up(B, bb)

    # Zero-pad everything to lane-aligned shapes; weights in bf16, biases in f32.
    xp  = _pad2(x, Bp, IN_PAD).astype(jnp.bfloat16)
    w1p = _pad2(w1, IN_PAD, H_PAD).astype(jnp.bfloat16)
    b1p = _pad2(b1, 1, H_PAD).astype(jnp.float32)
    w2p = _pad2(w2, H_PAD, H_PAD).astype(jnp.bfloat16)
    b2p = _pad2(b2, 1, H_PAD).astype(jnp.float32)
    w3p = _pad2(w3, H_PAD, OUT_PAD).astype(jnp.bfloat16)
    b3p = _pad2(b3, 1, OUT_PAD).astype(jnp.float32)

    inputs = [xp, w1p, b1p, w2p, b2p, w3p, b3p]
    in_specs = [
        pl.BlockSpec((bb, IN_PAD), lambda i: (i, 0)),
        pl.BlockSpec((IN_PAD, H_PAD), lambda i: (0, 0)),
        pl.BlockSpec((1, H_PAD), lambda i: (0, 0)),
        pl.BlockSpec((H_PAD, H_PAD), lambda i: (0, 0)),
        pl.BlockSpec((1, H_PAD), lambda i: (0, 0)),
        pl.BlockSpec((H_PAD, OUT_PAD), lambda i: (0, 0)),
        pl.BlockSpec((1, OUT_PAD), lambda i: (0, 0)),
    ]

    if use_dropout:
        # TODO(synk): dropout mask uses jax.random, so it is deterministic per key
        # but not bit-identical to torch.nn.Dropout's RNG stream.
        if key is None:
            key = jax.random.PRNGKey(0)
        m1, m2 = _make_dropout_masks(key, float(dropout_prob), Bp)
        inputs += [m1, m2]
        in_specs += [pl.BlockSpec((bb, H_PAD), lambda i: (i, 0)),
                     pl.BlockSpec((bb, H_PAD), lambda i: (i, 0))]

    kernel = functools.partial(mlp_kernel, use_dropout=use_dropout)

    out = pl.pallas_call(
        kernel,
        out_shape=jax.ShapeDtypeStruct((Bp, OUT_PAD), jnp.float32),
        grid=(Bp // bb,),
        in_specs=in_specs,
        out_specs=pl.BlockSpec((bb, OUT_PAD), lambda i: (i, 0)),
        compiler_params=pltpu.CompilerParams(
            dimension_semantics=("parallel",)),
    )(*inputs)

    return out[:B, :OUT_DIM]


def init_params(key):
    """Deterministic init matching PyTorch nn.Linear defaults:
    U(-1/sqrt(fan_in), 1/sqrt(fan_in)) for both weight and bias. w is (in, out)."""
    def linear(k, fan_in, fan_out):
        kw, kb = jax.random.split(k)
        bound = 1.0 / (fan_in ** 0.5)
        w = jax.random.uniform(kw, (fan_in, fan_out), jnp.float32, -bound, bound)
        b = jax.random.uniform(kb, (1, fan_out), jnp.float32, -bound, bound)
        return w, b
    k1, k2, k3 = jax.random.split(key, 3)
    w1, b1 = linear(k1, IN_DIM, H_DIM)
    w2, b2 = linear(k2, H_DIM, H_DIM)
    w3, b3 = linear(k3, H_DIM, OUT_DIM)
    return (w1, b1, w2, b2, w3, b3)


def _bf16_dot(a, w):
    return jnp.dot(a.astype(jnp.bfloat16), w.astype(jnp.bfloat16),
                   preferred_element_type=jnp.float32)


def reference_eval(x, params):
    """Pure-JAX reference of the eval-mode forward (dropout = identity),
    using the same bf16-in / f32-accumulate matmul precision as the kernel."""
    w1, b1, w2, b2, w3, b3 = params
    h = jnp.maximum(_bf16_dot(x, w1) + b1, 0.0)
    h = jnp.maximum(_bf16_dot(h, w2) + b2, 0.0)
    return _bf16_dot(h, w3) + b3


def reference_train(x, params, m1, m2):
    """Training-mode reference using the same masks (already sliced to H_DIM)."""
    w1, b1, w2, b2, w3, b3 = params
    h = jnp.maximum(_bf16_dot(x, w1) + b1, 0.0) * m1
    h = jnp.maximum(_bf16_dot(h, w2) + b2, 0.0) * m2
    return _bf16_dot(h, w3) + b3


if __name__ == "__main__":
    key = jax.random.PRNGKey(0)
    kx, kp = jax.random.split(key)
    B = 32                                    # small test batch (fits in one tile)
    x = jax.random.normal(kx, (B, IN_DIM), dtype=jnp.float32)
    params = init_params(kp)

    # Eval-mode forward (dropout is identity, like module.eval() in PyTorch).
    out_eval = mnist_2nn_forward(x, params, dropout_prob=0.5, training=False)
    out_eval = jax.block_until_ready(out_eval)
    ref = reference_eval(x, params)
    assert out_eval.shape == (B, OUT_DIM)
    assert jnp.allclose(out_eval, ref, atol=2e-2, rtol=2e-2), "eval mismatch vs reference"

    # Training-mode forward (exercises the dropout path).
    p = 0.5
    dkey = jax.random.PRNGKey(123)
    out_train = mnist_2nn_forward(x, params, dropout_prob=p, training=True, key=dkey)
    out_train = jax.block_until_ready(out_train)
    assert out_train.shape == (B, OUT_DIM)
    # Rebuild the same masks (B == tile size here, so no batch padding) and compare.
    m1, m2 = _make_dropout_masks(dkey, p, B)
    ref_train = reference_train(x, params, m1[:, :H_DIM], m2[:, :H_DIM])
    assert jnp.allclose(out_train, ref_train, atol=2e-2, rtol=2e-2), \
        "train mismatch vs reference"
    assert bool(jnp.all(jnp.isfinite(out_train)))

    print("KERNEL_OK")
</pallas_src>

<mosaic_0001>
module attributes {stable_mosaic.version = 11 : i64} {
  func.func @mlp_kernel(%arg0: i32, %arg1: memref<32x896xbf16, #tpu.memory_space<vmem>>, %arg2: memref<896x256xbf16, #tpu.memory_space<vmem>>, %arg3: memref<1x256xf32, #tpu.memory_space<vmem>>, %arg4: memref<256x256xbf16, #tpu.memory_space<vmem>>, %arg5: memref<1x256xf32, #tpu.memory_space<vmem>>, %arg6: memref<256x128xbf16, #tpu.memory_space<vmem>>, %arg7: memref<1x128xf32, #tpu.memory_space<vmem>>, %arg8: memref<32x128xf32, #tpu.memory_space<vmem>>) attributes {dimension_semantics = [#tpu.dimension_semantics<parallel>], iteration_bounds = array<i64: 1>, scalar_prefetch = 0 : i64, scratch_operands = 0 : i64, tpu.core_type = #tpu.core_type<tc>, window_params = [{transform_indices = @transform_0, window_bounds = array<i64: 32, 896>}, {pipeline_mode = #tpu.pipeline_mode<synchronous>, transform_indices = @transform_1, window_bounds = array<i64: 896, 256>}, {pipeline_mode = #tpu.pipeline_mode<synchronous>, transform_indices = @transform_2, window_bounds = array<i64: 1, 256>}, {pipeline_mode = #tpu.pipeline_mode<synchronous>, transform_indices = @transform_3, window_bounds = array<i64: 256, 256>}, {pipeline_mode = #tpu.pipeline_mode<synchronous>, transform_indices = @transform_4, window_bounds = array<i64: 1, 256>}, {pipeline_mode = #tpu.pipeline_mode<synchronous>, transform_indices = @transform_5, window_bounds = array<i64: 256, 128>}, {pipeline_mode = #tpu.pipeline_mode<synchronous>, transform_indices = @transform_6, window_bounds = array<i64: 1, 128>}, {transform_indices = @transform_7, window_bounds = array<i64: 32, 128>}]} {
    %c0 = arith.constant 0 : index
    %c0_0 = arith.constant 0 : index
    %0 = vector.load %arg1[%c0, %c0_0] : memref<32x896xbf16, #tpu.memory_space<vmem>>, vector<32x896xbf16>
    %c0_1 = arith.constant 0 : index
    %c0_2 = arith.constant 0 : index
    %1 = vector.load %arg2[%c0_1, %c0_2] : memref<896x256xbf16, #tpu.memory_space<vmem>>, vector<896x256xbf16>
    %cst = arith.constant dense<0.000000e+00> : vector<32x256xf32>
    %2 = tpu.matmul %0, %1, %cst {dimension_numbers = #tpu.dot_dimension_numbers<[1], [0], [0], [1], [0, 0, 1, 1], [], []>} : vector<32x896xbf16>, vector<896x256xbf16>, vector<32x256xf32> -> vector<32x256xf32>
    %c0_3 = arith.constant 0 : index
    %c0_4 = arith.constant 0 : index
    %3 = vector.load %arg3[%c0_3, %c0_4] : memref<1x256xf32, #tpu.memory_space<vmem>>, vector<1x256xf32>
    %4 = vector.broadcast %3 : vector<1x256xf32> to vector<32x256xf32>
    %5 = arith.addf %2, %4 : vector<32x256xf32>
    %cst_5 = arith.constant 0.000000e+00 : f32
    %6 = vector.broadcast %cst_5 : f32 to vector<32x256xf32>
    %7 = arith.maximumf %5, %6 : vector<32x256xf32>
    %8 = arith.truncf %7 : vector<32x256xf32> to vector<32x256xbf16>
    %c0_6 = arith.constant 0 : index
    %c0_7 = arith.constant 0 : index
    %9 = vector.load %arg4[%c0_6, %c0_7] : memref<256x256xbf16, #tpu.memory_space<vmem>>, vector<256x256xbf16>
    %cst_8 = arith.constant dense<0.000000e+00> : vector<32x256xf32>
    %10 = tpu.matmul %8, %9, %cst_8 {dimension_numbers = #tpu.dot_dimension_numbers<[1], [0], [0], [1], [0, 0, 1, 1], [], []>} : vector<32x256xbf16>, vector<256x256xbf16>, vector<32x256xf32> -> vector<32x256xf32>
    %c0_9 = arith.constant 0 : index
    %c0_10 = arith.constant 0 : index
    %11 = vector.load %arg5[%c0_9, %c0_10] : memref<1x256xf32, #tpu.memory_space<vmem>>, vector<1x256xf32>
    %12 = vector.broadcast %11 : vector<1x256xf32> to vector<32x256xf32>
    %13 = arith.addf %10, %12 : vector<32x256xf32>
    %cst_11 = arith.constant 0.000000e+00 : f32
    %14 = vector.broadcast %cst_11 : f32 to vector<32x256xf32>
    %15 = arith.maximumf %13, %14 : vector<32x256xf32>
    %16 = arith.truncf %15 : vector<32x256xf32> to vector<32x256xbf16>
    %c0_12 = arith.constant 0 : index
    %c0_13 = arith.constant 0 : index
    %17 = vector.load %arg6[%c0_12, %c0_13] : memref<256x128xbf16, #tpu.memory_space<vmem>>, vector<256x128xbf16>
    %cst_14 = arith.constant dense<0.000000e+00> : vector<32x128xf32>
    %18 = tpu.matmul %16, %17, %cst_14 {dimension_numbers = #tpu.dot_dimension_numbers<[1], [0], [0], [1], [0, 0, 1, 1], [], []>} : vector<32x256xbf16>, vector<256x128xbf16>, vector<32x128xf32> -> vector<32x128xf32>
    %c0_15 = arith.constant 0 : index
    %c0_16 = arith.constant 0 : index
    %19 = vector.load %arg7[%c0_15, %c0_16] : memref<1x128xf32, #tpu.memory_space<vmem>>, vector<1x128xf32>
    %20 = vector.broadcast %19 : vector<1x128xf32> to vector<32x128xf32>
    %21 = arith.addf %18, %20 : vector<32x128xf32>
    %c0_17 = arith.constant 0 : index
    %c0_18 = arith.constant 0 : index
    %22 = vector.load %arg8[%c0_17, %c0_18] : memref<32x128xf32, #tpu.memory_space<vmem>>, vector<32x128xf32>
    tpu.vector_store %arg8[%c0_17, %c0_18], %21 {strides = array<i32>} : memref<32x128xf32, #tpu.memory_space<vmem>>, vector<32x128xf32>,
    return
  }
  func.func @transform_0(%arg0: i32) -> (i32, i32) {
    %c0_i32 = arith.constant 0 : i32
    %c0_i32_0 = arith.constant 0 : i32
    return %arg0, %c0_i32 : i32, i32
  }
  func.func @transform_1(%arg0: i32) -> (i32, i32) {
    %c0_i32 = arith.constant 0 : i32
    %c0_i32_0 = arith.constant 0 : i32
    %c0_i32_1 = arith.constant 0 : i32
    return %c0_i32, %c0_i32_0 : i32, i32
  }
  func.func @transform_2(%arg0: i32) -> (i32, i32) {
    %c0_i32 = arith.constant 0 : i32
    %c0_i32_0 = arith.constant 0 : i32
    %c0_i32_1 = arith.constant 0 : i32
    return %c0_i32, %c0_i32_0 : i32, i32
  }
  func.func @transform_3(%arg0: i32) -> (i32, i32) {
    %c0_i32 = arith.constant 0 : i32
    %c0_i32_0 = arith.constant 0 : i32
    %c0_i32_1 = arith.constant 0 : i32
    return %c0_i32, %c0_i32_0 : i32, i32
  }
  func.func @transform_4(%arg0: i32) -> (i32, i32) {
    %c0_i32 = arith.constant 0 : i32
    %c0_i32_0 = arith.constant 0 : i32
    %c0_i32_1 = arith.constant 0 : i32
    return %c0_i32, %c0_i32_0 : i32, i32
  }
  func.func @transform_5(%arg0: i32) -> (i32, i32) {
    %c0_i32 = arith.constant 0 : i32
    %c0_i32_0 = arith.constant 0 : i32
    %c0_i32_1 = arith.constant 0 : i32
    return %c0_i32, %c0_i32_0 : i32, i32
  }
  func.func @transform_6(%arg0: i32) -> (i32, i32) {
    %c0_i32 = arith.constant 0 : i32
    %c0_i32_0 = arith.constant 0 : i32
    %c0_i32_1 = arith.constant 0 : i32
    return %c0_i32, %c0_i32_0 : i32, i32
  }
  func.func @transform_7(%arg0: i32) -> (i32, i32) {
    %c0_i32 = arith.constant 0 : i32
    %c0_i32_0 = arith.constant 0 : i32
    return %arg0, %c0_i32 : i32, i32
  }
}

</mosaic_0001>

<bundles_post_ra>
// kernel: tpu_custom_call.1
= control target key start
LH: loop header
LB: loop body
LE: loop exit
PB: predicated region body
PF: predicated region fallthrough
CT: control target
= control target key end

     0   :  { %12 = vsyncpa [#allocation3], 0  ;;  %s2814_s0 = inlined_call_operand.hbm [shape: bf16[32,896], index: 0, kind: input, shape index: {}]   ;;  %s2815_s1 = inlined_call_operand.hbm [shape: bf16[896,256], index: 1, kind: input, shape index: {}]   ;;  %s2816_s2 = inlined_call_operand.hbm [shape: f32[1,256], index: 2, kind: input, shape index: {}]   ;;  %s2817_s3 = inlined_call_operand.hbm [shape: bf16[256,256], index: 3, kind: input, shape index: {}]   ;;  %s2818_s4 = inlined_call_operand.vmem [shape: f32[1,256], index: 4, kind: input, shape index: {}]   ;;  %s2819_s5 = inlined_call_operand.hbm [shape: bf16[256,128], index: 5, kind: input, shape index: {}]   ;;  %s2820_s6 = inlined_call_operand.vmem [shape: f32[1,128], index: 6, kind: input, shape index: {}]   ;;  %s2821_s7 = inlined_call_operand.hbm [shape: f32[32,128], index: 7, kind: output, shape index: {}]  }
   0x1   :  { %13 = vsyncpa [#allocation6], 0 }
   0x2   :  { %14 = vsyncpa [#allocation9], 0  ;;  %s33_s26 = sshll.u32 %s2815_s1, 4  ;;  %s34_s26 = int_to_ptr.hbm [resolvable:$true] %s33_s26 }
   0x3   :  { %15 = vsyncpa [#allocation4], 0  ;;  %s2663_s27 = smov [#allocation5]   ;;  %s57_s8 = sshll.u32 %s2817_s3, 4  ;;  %s58_s8 = int_to_ptr.hbm [resolvable:$true] %s57_s8 }
   0x4   :  { %s35_s28 = sshll.u32 %s2663_s27, 4  ;;  %s2664_s9 = smov 128   ;;  %s36_s28 = int_to_ptr.vmem [resolvable:$true] %s35_s28 }
   0x5   :  { %s2665_s10 = smov 8   ;;  %s2666_s11 = smov [#allocation8]  }
   0x6   :  { %41 = dma.hbm_to_vmem [thread:$0]  %s34_s26, 14336, %s36_s28, [#allocation6], %s2664_s9, %s2664_s9, %s2665_s10  }
   0x7   :  { %s59_s12 = sshll.u32 %s2666_s11, 4  ;;  %s20_s14 = sshll.u32 %s2814_s0, 4  ;;  %s60_s12 = int_to_ptr.vmem [resolvable:$true] %s59_s12  ;;  %s21_s14 = int_to_ptr.hbm [resolvable:$true] %s20_s14 }
   0x8   :  { %65 = dma.hbm_to_vmem [thread:$0]  %s58_s8, 4096, %s60_s12, [#allocation9], %s2664_s9, %s2664_s9, %s2665_s10  }
   0x9   :  { %s2667_s3 = smov [#allocation2]   ;;  %s47_s18 = sshll.u32 %s2816_s2, 4  ;;  %s48_s18 = int_to_ptr.hbm [resolvable:$true] %s47_s18 }
   0xa   :  { %s22_s15 = sshll.u32 %s2667_s3, 4  ;;  %s2668_s19 = smov 448   ;;  %s23_s15 = int_to_ptr.vmem [resolvable:$true] %s22_s15 }
   0xb   :  { %s2669_s20 = smov 28   ;;  %s2670_s21 = smov [#allocation7]  }
   0xc   :  { %28 = dma.hbm_to_vmem [thread:$0]  %s21_s14, 1792, %s23_s15, [#allocation3], %s2668_s19, %s2668_s19, %s2669_s20  }
   0xd   :  { %s49_s22 = sshll.u32 %s2670_s21, 4  ;;  %s72_s24 = sshll.u32 %s2819_s5, 4  ;;  %s50_s22 = int_to_ptr.vmem [resolvable:$true] %s49_s22  ;;  %s73_s24 = int_to_ptr.hbm [resolvable:$true] %s72_s24 }
   0xe   :  { %52 = dma.hbm_to_vmem [thread:$0]  %s48_s18, 32, %s50_s22, [#allocation6]  }
   0xf   :  { %s2671_s25 = smov [#allocation10]   ;;  %s2672_s27 = smov 64  }
  0x10   :  { %s74_s26 = sshll.u32 %s2671_s25, 4  ;;  %s2673_s28 = smov 4   ;;  %s75_s26 = int_to_ptr.vmem [resolvable:$true] %s74_s26 }
  0x11   :  { %80 = dma.hbm_to_vmem [thread:$0]  %s73_s24, 2048, %s75_s26, [#allocation9], %s2672_s27, %s2672_s27, %s2673_s28  }
  0x12   :  { %2655 = dma.done.wait [#allocation3], 1792  }
  0x13   :  { %2656 = vsyncadd [#allocation3], 4294965504 }
  0x14   :  { %2657 = dma.done.wait [#allocation6], 14368  }
  0x15   :  { %2658 = vsyncadd [#allocation6], 4294952928 }
  0x16   :  { %2659 = dma.done.wait [#allocation9], 6144  }
  0x17   :  { %2660 = vsyncadd [#allocation9], 4294961152  ;;  %v1742_v0 = vld [vmem:[#allocation5 + $0x70] sm:$0xf]  ;;  %v2353_v1 = vld [vmem:[#allocation5 + $0x74] sm:$0xf0] }
  0x18   :  { %v1806_v2 = vld [vmem:[#allocation5 + $0xf0] sm:$0xf]  ;;  %v1743_v3 = vor.u32 %v2353_v1, %v1742_v0  ;;  %v2369_v4 = vld [vmem:[#allocation5 + $0xf4] sm:$0xf0]  ;;  %v1734_v11 = vld [vmem:[#allocation5 + $0x60] sm:$0xf] }
  0x19   :  { %v1870_v5 = vld [vmem:[#allocation5 + $0x170] sm:$0xf]  ;;  %v2385_v6 = vld [vmem:[#allocation5 + $0x174] sm:$0xf0]  ;;  %v1807_v7 = vor.u32 %v2369_v4, %v1806_v2  ;;  %v2351_v13 = vld [vmem:[#allocation5 + $0x64] sm:$0xf0] }
  0x1a   :  { %v1871_v8 = vor.u32 %v2385_v6, %v1870_v5  ;;  %v1934_v9 = vld [vmem:[#allocation5 + $0x1f0] sm:$0xf]  ;;  %v2401_v10 = vld [vmem:[#allocation5 + $0x1f4] sm:$0xf0]  ;;  %869 = vmatpush.bf16.msra.mxu0 %v1743_v3  ;;  %v1798_v14 = vld [vmem:[#allocation5 + $0xe0] sm:$0xf]  ;;  %v1735_v16 = vor.u32 %v2351_v13, %v1734_v11 }
  0x1b   :  { %v1935_v12 = vor.u32 %v2401_v10, %v1934_v9  ;;  %v2367_v15 = vld [vmem:[#allocation5 + $0xe4] sm:$0xf0]  ;;  %888 = vmatpush.bf16.msra.mxu1 %v1807_v7  ;;  %v1862_v18 = vld [vmem:[#allocation5 + $0x160] sm:$0xf]  ;;  %v1726_v23 = vld [vmem:[#allocation5 + $0x50] sm:$0xf] }
  0x1c   :  { %907 = vmatpush.bf16.msra.mxu2 %v1871_v8  ;;  %v1799_v17 = vor.u32 %v2367_v15, %v1798_v14  ;;  %v2383_v19 = vld [vmem:[#allocation5 + $0x164] sm:$0xf0]  ;;  %v1926_v20 = vld [vmem:[#allocation5 + $0x1e0] sm:$0xf]  ;;  %v2349_v24 = vld [vmem:[#allocation5 + $0x54] sm:$0xf0] }
  0x1d   :  { %926 = vmatpush.bf16.msra.mxu3 %v1935_v12  ;;  %v1863_v21 = vor.u32 %v2383_v19, %v1862_v18  ;;  %v2399_v22 = vld [vmem:[#allocation5 + $0x1e4] sm:$0xf0]  ;;  %v1790_v26 = vld [vmem:[#allocation5 + $0xd0] sm:$0xf]  ;;  %v2365_v27 = vld [vmem:[#allocation5 + $0xd4] sm:$0xf0]  ;;  %v1727_v29 = vor.u32 %v2349_v24, %v1726_v23 }
  0x1e   :  { %v1927_v25 = vor.u32 %v2399_v22, %v1926_v20  ;;  %v1854_v28 = vld [vmem:[#allocation5 + $0x150] sm:$0xf]  ;;  %870 = vmatpush.bf16.msra.mxu0 %v1735_v16  ;;  %v2381_v30 = vld [vmem:[#allocation5 + $0x154] sm:$0xf0]  ;;  %v1791_v33 = vor.u32 %v2365_v27, %v1790_v26  ;;  %v1718_v35 = vld [vmem:[#allocation5 + $0x40] sm:$0xf] }
  0x1f   :  { %v1918_v31 = vld [vmem:[#allocation5 + $0x1d0] sm:$0xf]  ;;  %v2397_v32 = vld [vmem:[#allocation5 + $0x1d4] sm:$0xf0]  ;;  %889 = vmatpush.bf16.msra.mxu1 %v1799_v17  ;;  %v1855_v34 = vor.u32 %v2381_v30, %v1854_v28  ;;  %v2347_v36 = vld [vmem:[#allocation5 + $0x44] sm:$0xf0] }
  0x20   :  { %908 = vmatpush.bf16.msra.mxu2 %v1863_v21  ;;  %v1782_v37 = vld [vmem:[#allocation5 + $0xc0] sm:$0xf]  ;;  %v1919_v38 = vor.u32 %v2397_v32, %v1918_v31  ;;  %v2363_v39 = vld [vmem:[#allocation5 + $0xc4] sm:$0xf0]  ;;  %v1719_v44 = vor.u32 %v2347_v36, %v1718_v35  ;;  %v1710_v47 = vld [vmem:[#allocation5 + $0x30] sm:$0xf] }
  0x21   :  { %927 = vmatpush.bf16.msra.mxu3 %v1927_v25  ;;  %v1846_v40 = vld [vmem:[#allocation5 + $0x140] sm:$0xf]  ;;  %v2379_v41 = vld [vmem:[#allocation5 + $0x144] sm:$0xf0]  ;;  %v1783_v45 = vor.u32 %v2363_v39, %v1782_v37  ;;  %v2345_v48 = vld [vmem:[#allocation5 + $0x34] sm:$0xf0] }
  0x22   :  { %v1910_v42 = vld [vmem:[#allocation5 + $0x1c0] sm:$0xf]  ;;  %v2395_v43 = vld [vmem:[#allocation5 + $0x1c4] sm:$0xf0]  ;;  %871 = vmatpush.bf16.msra.mxu0 %v1727_v29  ;;  %v1847_v46 = vor.u32 %v2379_v41, %v1846_v40  ;;  %v1774_v49 = vld [vmem:[#allocation5 + $0xb0] sm:$0xf]  ;;  %v1711_v56 = vor.u32 %v2345_v48, %v1710_v47 }
  0x23   :  { %890 = vmatpush.bf16.msra.mxu1 %v1791_v33  ;;  %v1911_v50 = vor.u32 %v2395_v43, %v1910_v42  ;;  %v2361_v51 = vld [vmem:[#allocation5 + $0xb4] sm:$0xf0]  ;;  %v1838_v52 = vld [vmem:[#allocation5 + $0x130] sm:$0xf]  ;;  %v1702_v59 = vld [vmem:[#allocation5 + $0x20] sm:$0xf] }
  0x24   :  { %909 = vmatpush.bf16.msra.mxu2 %v1855_v34  ;;  %v2377_v53 = vld [vmem:[#allocation5 + $0x134] sm:$0xf0]  ;;  %v1902_v54 = vld [vmem:[#allocation5 + $0x1b0] sm:$0xf]  ;;  %v1775_v57 = vor.u32 %v2361_v51, %v1774_v49  ;;  %v2343_v60 = vld [vmem:[#allocation5 + $0x24] sm:$0xf0] }
  0x25   :  { %928 = vmatpush.bf16.msra.mxu3 %v1919_v38  ;;  %v2393_v55 = vld [vmem:[#allocation5 + $0x1b4] sm:$0xf0]  ;;  %v1839_v58 = vor.u32 %v2377_v53, %v1838_v52  ;;  %v1766_v61 = vld [vmem:[#allocation5 + $0xa0] sm:$0xf]  ;;  %v2359_v63 = vld [vmem:[#allocation5 + $0xa4] sm:$0xf0]  ;;  %v1703_v4 = vor.u32 %v2343_v60, %v1702_v59 }
  0x26   :  { %872 = vmatpush.bf16.msra.mxu0 %v1719_v44  ;;  %v1903_v62 = vor.u32 %v2393_v55, %v1902_v54  ;;  %v1830_v0 = vld [vmem:[#allocation5 + $0x120] sm:$0xf]  ;;  %v2375_v1 = vld [vmem:[#allocation5 + $0x124] sm:$0xf0]  ;;  %v1767_v5 = vor.u32 %v2359_v63, %v1766_v61  ;;  %v1694_v7 = vld [vmem:[#allocation5 + $0x10] sm:$0xf] }
  0x27   :  { %891 = vmatpush.bf16.msra.mxu1 %v1783_v45  ;;  %v1894_v2 = vld [vmem:[#allocation5 + $0x1a0] sm:$0xf]  ;;  %v2391_v3 = vld [vmem:[#allocation5 + $0x1a4] sm:$0xf0]  ;;  %v1831_v6 = vor.u32 %v2375_v1, %v1830_v0  ;;  %v2341_v8 = vld [vmem:[#allocation5 + $0x14] sm:$0xf0] }
  0x28   :  { %910 = vmatpush.bf16.msra.mxu2 %v1847_v46  ;;  %v1758_v9 = vld [vmem:[#allocation5 + $0x90] sm:$0xf]  ;;  %v1895_v10 = vor.u32 %v2391_v3, %v1894_v2  ;;  %v2357_v11 = vld [vmem:[#allocation5 + $0x94] sm:$0xf0]  ;;  %v1686_v16 = vld [vmem:[#allocation5] sm:$0xf]  ;;  %v1695_v17 = vor.u32 %v2341_v8, %v1694_v7 }
  0x29   :  { %929 = vmatpush.bf16.msra.mxu3 %v1911_v50  ;;  %v1822_v12 = vld [vmem:[#allocation5 + $0x110] sm:$0xf]  ;;  %v2373_v13 = vld [vmem:[#allocation5 + $0x114] sm:$0xf0]  ;;  %v2339_v18 = vld [vmem:[#allocation5 + $0x4] sm:$0xf0]  ;;  %v1759_v21 = vor.u32 %v2357_v11, %v1758_v9 }
  0x2a   :  { %873 = vmatpush.bf16.msra.mxu0 %v1711_v56  ;;  %v1886_v14 = vld [vmem:[#allocation5 + $0x190] sm:$0xf]  ;;  %v2389_v15 = vld [vmem:[#allocation5 + $0x194] sm:$0xf0]  ;;  %v1750_v19 = vld [vmem:[#allocation5 + $0x80] sm:$0xf]  ;;  %v1823_v22 = vor.u32 %v2373_v13, %v1822_v12  ;;  %v1687_v34 = vor.u32 %v2339_v18, %v1686_v16 }
  0x2b   :  { %892 = vmatpush.bf16.msra.mxu1 %v1775_v57  ;;  %v2355_v20 = vld [vmem:[#allocation5 + $0x84] sm:$0xf0]  ;;  %v1814_v23 = vld [vmem:[#allocation5 + $0x100] sm:$0xf]  ;;  %v1887_v26 = vor.u32 %v2389_v15, %v1886_v14  ;;  %v1630_v28 = vld [vmem:[#allocation2] sm:$0xf] }
  0x2c   :  { %911 = vmatpush.bf16.msra.mxu2 %v1839_v58  ;;  %v2371_v24 = vld [vmem:[#allocation5 + $0x104] sm:$0xf0]  ;;  %v1878_v25 = vld [vmem:[#allocation5 + $0x180] sm:$0xf]  ;;  %v2327_v29 = vld [vmem:[#allocation2 + $0x18] sm:$0xf0]  ;;  %v1751_v38 = vor.u32 %v2355_v20, %v1750_v19 }
  0x2d   :  { %930 = vmatpush.bf16.msra.mxu3 %v1903_v62  ;;  %v2387_v27 = vld [vmem:[#allocation5 + $0x184] sm:$0xf0]  ;;  %v2324_v30 = vld [vmem:[#allocation2 + $0x4] sm:$0xf]  ;;  %v1632_v31 = vld [vmem:[#allocation2 + $0x1c] sm:$0xf0]  ;;  %v1815_v39 = vor.u32 %v2371_v24, %v1814_v23  ;;  %v2736_v48 = vor.u32 %v2327_v29, %v1630_v28 }
  0x2e   :  { %874 = vmatpush.bf16.msra.mxu0 %v1703_v4  ;;  %v1998_v32 = vld [vmem:[#allocation5 + $0x270] sm:$0xf]  ;;  %v2417_v33 = vld [vmem:[#allocation5 + $0x274] sm:$0xf0]  ;;  %v2328_v40 = vld [vmem:[#allocation2 + $0x20] sm:$0xf0]  ;;  %v1879_v43 = vor.u32 %v2387_v27, %v1878_v25  ;;  %v2738_v53 = vor.u32 %v2324_v30, %v1632_v31 }
  0x2f   :  { %893 = vmatpush.bf16.msra.mxu1 %v1767_v5  ;;  %v1638_v35 = vld [vmem:[#allocation2 + $0x8] sm:$0xf]  ;;  %v2062_v36 = vld [vmem:[#allocation5 + $0x2f0] sm:$0xf]  ;;  %v1999_v44 = vor.u32 %v2417_v33, %v1998_v32  ;;  %v2325_v45 = vld [vmem:[#allocation2 + $0xc] sm:$0xf] }
  0x30   :  { %912 = vmatpush.bf16.msra.mxu2 %v1831_v6  ;;  %v2433_v37 = vld [vmem:[#allocation5 + $0x2f4] sm:$0xf0]  ;;  %v2126_v41 = vld [vmem:[#allocation5 + $0x370] sm:$0xf]  ;;  %v2352_v47 = vld [vmem:[#allocation5 + $0x74] sm:$0xf]  ;;  %v2740_v54 = vor.u32 %v2328_v40, %v1638_v35 }
  0x31   :  { %931 = vmatpush.bf16.msra.mxu3 %v1895_v10  ;;  %v2449_v42 = vld [vmem:[#allocation5 + $0x374] sm:$0xf0]  ;;  %v2063_v49 = vor.u32 %v2433_v37, %v2062_v36  ;;  %v1744_v50 = vld [vmem:[#allocation5 + $0x78] sm:$0xf0]  ;;  %v1990_v51 = vld [vmem:[#allocation5 + $0x260] sm:$0xf] }
  0x32   :  { %875 = vmatpush.bf16.msra.mxu0 %v1695_v17  ;;  %v1640_v46 = vld [vmem:[#allocation2 + $0x24] sm:$0xf0]  ;;  %v2415_v52 = vld [vmem:[#allocation5 + $0x264] sm:$0xf0]  ;;  %v2054_v55 = vld [vmem:[#allocation5 + $0x2e0] sm:$0xf]  ;;  %v2127_v57 = vor.u32 %v2449_v42, %v2126_v41  ;;  %v1747_v59 = vor.u32 %v2352_v47, %v1744_v50 }
  0x33   :  { %894 = vmatpush.bf16.msra.mxu1 %v1759_v21  ;;  %v2431_v56 = vld [vmem:[#allocation5 + $0x2e4] sm:$0xf0]  ;;  %v2742_v58 = vor.u32 %v2325_v45, %v1640_v46  ;;  %v1991_v60 = vor.u32 %v2415_v52, %v1990_v51  ;;  %v2118_v61 = vld [vmem:[#allocation5 + $0x360] sm:$0xf]  ;;  %v2350_v63 = vld [vmem:[#allocation5 + $0x64] sm:$0xf] }
  0x34   :  { %913 = vmatpush.bf16.msra.mxu2 %v1823_v22  ;;  %v2447_v62 = vld [vmem:[#allocation5 + $0x364] sm:$0xf0]  ;;  %v2055_v0 = vor.u32 %v2431_v56, %v2054_v55  ;;  %v1736_v1 = vld [vmem:[#allocation5 + $0x68] sm:$0xf0]  ;;  %v1982_v2 = vld [vmem:[#allocation5 + $0x250] sm:$0xf] }
  0x35   :  { %932 = vmatpush.bf16.msra.mxu3 %v1887_v26  ;;  %v2413_v3 = vld [vmem:[#allocation5 + $0x254] sm:$0xf0]  ;;  %v2046_v4 = vld [vmem:[#allocation5 + $0x2d0] sm:$0xf]  ;;  %v2119_v6 = vor.u32 %v2447_v62, %v2118_v61  ;;  %v1739_v7 = vor.u32 %v2350_v63, %v1736_v1  ;;  %v2348_v11 = vld [vmem:[#allocation5 + $0x54] sm:$0xf] }
  0x36   :  { %876 = vmatpush.bf16.msra.mxu0 %v1687_v34  ;;  %v2429_v5 = vld [vmem:[#allocation5 + $0x2d4] sm:$0xf0]  ;;  %v1983_v8 = vor.u32 %v2413_v3, %v1982_v2  ;;  %v2110_v9 = vld [vmem:[#allocation5 + $0x350] sm:$0xf]  ;;  %v1728_v13 = vld [vmem:[#allocation5 + $0x58] sm:$0xf0] }
  0x37   :  { %895 = vmatpush.bf16.msra.mxu1 %v1751_v38  ;;  %v2445_v10 = vld [vmem:[#allocation5 + $0x354] sm:$0xf0]  ;;  %v2047_v12 = vor.u32 %v2429_v5, %v2046_v4  ;;  %v1974_v14 = vld [vmem:[#allocation5 + $0x240] sm:$0xf]  ;;  %v2411_v15 = vld [vmem:[#allocation5 + $0x244] sm:$0xf0]  ;;  %v1731_v22 = vor.u32 %v2348_v11, %v1728_v13 }
  0x38   :  { %914 = vmatpush.bf16.msra.mxu2 %v1815_v39  ;;  %v2038_v16 = vld [vmem:[#allocation5 + $0x2c0] sm:$0xf]  ;;  %v2427_v17 = vld [vmem:[#allocation5 + $0x2c4] sm:$0xf0]  ;;  %v2111_v18 = vor.u32 %v2445_v10, %v2110_v9  ;;  %v2346_v21 = vld [vmem:[#allocation5 + $0x44] sm:$0xf]  ;;  %v1975_v23 = vor.u32 %v2411_v15, %v1974_v14 }
  0x39   :  { %933 = vmatpush.bf16.msra.mxu3 %v1879_v43  ;;  %877 = vmatmul.bf16.vlgmr.msra.gmra.mxu0 %v2736_v48  ;;  %v2102_v19 = vld [vmem:[#allocation5 + $0x340] sm:$0xf]  ;;  %v2443_v20 = vld [vmem:[#allocation5 + $0x344] sm:$0xf0]  ;;  %v1720_v24 = vld [vmem:[#allocation5 + $0x48] sm:$0xf0]  ;;  %v2039_v27 = vor.u32 %v2427_v17, %v2038_v16 }
  0x3a   :  { %945 = vmatpush.bf16.msrb.mxu0 %v1999_v44  ;;  %896 = vmatmul.bf16.vlgmr.msra.gmra.mxu1 %v2738_v53  ;;  %v1658_v25 = vld [vmem:[#allocation2 + $0x38] sm:$0xf]  ;;  %v2334_v26 = vld [vmem:[#allocation2 + $0x50] sm:$0xf0]  ;;  %v2331_v28 = vld [vmem:[#allocation2 + $0x3c] sm:$0xf]  ;;  %v2103_v35 = vor.u32 %v2443_v20, %v2102_v19  ;;  %v1723_v39 = vor.u32 %v2346_v21, %v1720_v24 }
  0x3b   :  { %964 = vmatpush.bf16.msrb.mxu1 %v2063_v49  ;;  %915 = vmatmul.bf16.vlgmr.msra.gmra.mxu2 %v2740_v54  ;;  %v1660_v29 = vld [vmem:[#allocation2 + $0x54] sm:$0xf0]  ;;  %v1966_v30 = vld [vmem:[#allocation5 + $0x230] sm:$0xf]  ;;  %v2409_v31 = vld [vmem:[#allocation5 + $0x234] sm:$0xf0]  ;;  %v2748_v44 = vor.u32 %v2334_v26, %v1658_v25 }
  0x3c   :  { %983 = vmatpush.bf16.msrb.mxu2 %v2127_v57  ;;  %934 = vmatmul.bf16.vlgmr.msra.gmra.mxu3 %v2742_v58  ;;  %v1666_v32 = vld [vmem:[#allocation2 + $0x40] sm:$0xf]  ;;  %v2425_v34 = vld [vmem:[#allocation5 + $0x2b4] sm:$0xf0]  ;;  %v2335_v36 = vld [vmem:[#allocation2 + $0x58] sm:$0xf0]  ;;  %v1967_v40 = vor.u32 %v2409_v31, %v1966_v30  ;;  %v2750_v50 = vor.u32 %v2331_v28, %v1660_v29 }
  0x3d   :  { %1002 = vmatpush.bf16.msrb.mxu3 %v1747_v59  ;;  %v2030_v33 = vld [vmem:[#allocation5 + $0x2b0] sm:$0xf]  ;;  %v2441_v38 = vld [vmem:[#allocation5 + $0x334] sm:$0xf0]  ;;  %v2332_v41 = vld [vmem:[#allocation2 + $0x44] sm:$0xf]  ;;  %v2752_v51 = vor.u32 %v2335_v36, %v1666_v32 }
  0x3e   :  { %946 = vmatpush.bf16.msrb.mxu0 %v1991_v60  ;;  %v2094_v37 = vld [vmem:[#allocation5 + $0x330] sm:$0xf]  ;;  %v2344_v43 = vld [vmem:[#allocation5 + $0x34] sm:$0xf]  ;;  %v2031_v45 = vor.u32 %v2425_v34, %v2030_v33  ;;  %v1712_v46 = vld [vmem:[#allocation5 + $0x38] sm:$0xf0] }
  0x3f   :  { %965 = vmatpush.bf16.msrb.mxu1 %v2055_v0  ;;  %v1668_v42 = vld [vmem:[#allocation2 + $0x5c] sm:$0xf0]  ;;  %v1958_v47 = vld [vmem:[#allocation5 + $0x220] sm:$0xf]  ;;  %v2407_v49 = vld [vmem:[#allocation5 + $0x224] sm:$0xf0]  ;;  %v2095_v56 = vor.u32 %v2441_v38, %v2094_v37  ;;  %v1715_v59 = vor.u32 %v2344_v43, %v1712_v46 }
  0x40   :  { %984 = vmatpush.bf16.msrb.mxu2 %v2119_v6  ;;  %v2022_v52 = vld [vmem:[#allocation5 + $0x2a0] sm:$0xf]  ;;  %v2423_v55 = vld [vmem:[#allocation5 + $0x2a4] sm:$0xf0]  ;;  %v2754_v57 = vor.u32 %v2332_v41, %v1668_v42  ;;  %v1959_v60 = vor.u32 %v2407_v49, %v1958_v47  ;;  %v2342_v63 = vld [vmem:[#allocation5 + $0x24] sm:$0xf] }
  0x41   :  { %1003 = vmatpush.bf16.msrb.mxu3 %v1739_v7  ;;  %v2086_v61 = vld [vmem:[#allocation5 + $0x320] sm:$0xf]  ;;  %v2439_v62 = vld [vmem:[#allocation5 + $0x324] sm:$0xf0]  ;;  %v2023_v0 = vor.u32 %v2423_v55, %v2022_v52  ;;  %v1704_v1 = vld [vmem:[#allocation5 + $0x28] sm:$0xf0] }
  0x42   :  { %947 = vmatpush.bf16.msrb.mxu0 %v1983_v8  ;;  %v1950_v2 = vld [vmem:[#allocation5 + $0x210] sm:$0xf]  ;;  %v2405_v3 = vld [vmem:[#allocation5 + $0x214] sm:$0xf0]  ;;  %v2087_v6 = vor.u32 %v2439_v62, %v2086_v61  ;;  %v1707_v9 = vor.u32 %v2342_v63, %v1704_v1  ;;  %v2340_v11 = vld [vmem:[#allocation5 + $0x14] sm:$0xf] }
  0x43   :  { %966 = vmatpush.bf16.msrb.mxu1 %v2047_v12  ;;  %v2014_v4 = vld [vmem:[#allocation5 + $0x290] sm:$0xf]  ;;  %v2421_v5 = vld [vmem:[#allocation5 + $0x294] sm:$0xf0]  ;;  %v1951_v10 = vor.u32 %v2405_v3, %v1950_v2  ;;  %v1696_v12 = vld [vmem:[#allocation5 + $0x18] sm:$0xf0] }
  0x44   :  { %985 = vmatpush.bf16.msrb.mxu2 %v2111_v18  ;;  %v2078_v7 = vld [vmem:[#allocation5 + $0x310] sm:$0xf]  ;;  %v2437_v8 = vld [vmem:[#allocation5 + $0x314] sm:$0xf0]  ;;  %v1942_v13 = vld [vmem:[#allocation5 + $0x200] sm:$0xf]  ;;  %v2015_v14 = vor.u32 %v2421_v5, %v2014_v4  ;;  %v1699_v25 = vor.u32 %v2340_v11, %v1696_v12 }
  0x45   :  { %1004 = vmatpush.bf16.msrb.mxu3 %v1731_v22  ;;  %v2403_v15 = vld [vmem:[#allocation5 + $0x204] sm:$0xf0]  ;;  %v2006_v16 = vld [vmem:[#allocation5 + $0x280] sm:$0xf]  ;;  %v2368_v19 = vld [vmem:[#allocation5 + $0xf4] sm:$0xf]  ;;  %v2079_v21 = vor.u32 %v2437_v8, %v2078_v7 }
  0x46   :  { %948 = vmatpush.bf16.msrb.mxu0 %v1975_v23  ;;  %v2419_v17 = vld [vmem:[#allocation5 + $0x284] sm:$0xf0]  ;;  %v2070_v18 = vld [vmem:[#allocation5 + $0x300] sm:$0xf]  ;;  %v1808_v20 = vld [vmem:[#allocation5 + $0xf8] sm:$0xf0]  ;;  %v1943_v26 = vor.u32 %v2403_v15, %v1942_v13 }
  0x47   :  { %967 = vmatpush.bf16.msrb.mxu1 %v2039_v27  ;;  %v2435_v22 = vld [vmem:[#allocation5 + $0x304] sm:$0xf0]  ;;  %v2384_v23 = vld [vmem:[#allocation5 + $0x174] sm:$0xf]  ;;  %v1872_v24 = vld [vmem:[#allocation5 + $0x178] sm:$0xf0]  ;;  %v2007_v30 = vor.u32 %v2419_v17, %v2006_v16  ;;  %v1811_v32 = vor.u32 %v2368_v19, %v1808_v20 }
  0x48   :  { %986 = vmatpush.bf16.msrb.mxu2 %v2103_v35  ;;  %v2338_v27 = vld [vmem:[#allocation5 + $0x4] sm:$0xf]  ;;  %v1688_v28 = vld [vmem:[#allocation5 + $0x8] sm:$0xf0]  ;;  %v1646_v29 = vld [vmem:[#allocation2 + $0x10] sm:$0xf]  ;;  %v1875_v36 = vor.u32 %v2384_v23, %v1872_v24 }
  0x49   :  { %1005 = vmatpush.bf16.msrb.mxu3 %v1723_v39  ;;  %882 = vmatmul.bf16.gmra.mxu0 %v2748_v44  ;;  %v2329_v31 = vld [vmem:[#allocation2 + $0x28] sm:$0xf0]  ;;  %v2400_v33 = vld [vmem:[#allocation5 + $0x1f4] sm:$0xf]  ;;  %v2326_v35 = vld [vmem:[#allocation2 + $0x14] sm:$0xf]  ;;  %v2071_v39 = vor.u32 %v2435_v22, %v2070_v18  ;;  %v1691_v43 = vor.u32 %v2338_v27, %v1688_v28 }
  0x4a   :  { %949 = vmatpush.bf16.msrb.mxu0 %v1967_v40  ;;  %901 = vmatmul.bf16.gmra.mxu1 %v2750_v50  ;;  %v1936_v34 = vld [vmem:[#allocation5 + $0x1f8] sm:$0xf0]  ;;  %v2416_v37 = vld [vmem:[#allocation5 + $0x274] sm:$0xf]  ;;  %v1648_v40 = vld [vmem:[#allocation2 + $0x2c] sm:$0xf0]  ;;  %v2760_v52 = vor.u32 %v2329_v31, %v1646_v29 }
  0x4b   :  { %968 = vmatpush.bf16.msrb.mxu1 %v2031_v45  ;;  %920 = vmatmul.bf16.gmra.mxu2 %v2752_v51  ;;  %v2000_v38 = vld [vmem:[#allocation5 + $0x278] sm:$0xf0]  ;;  %v1654_v41 = vld [vmem:[#allocation2 + $0x18] sm:$0xf]  ;;  %v2330_v42 = vld [vmem:[#allocation2 + $0x30] sm:$0xf0]  ;;  %v1939_v45 = vor.u32 %v2400_v33, %v1936_v34  ;;  %v2762_v61 = vor.u32 %v2326_v35, %v1648_v40 }
  0x4c   :  { %987 = vmatpush.bf16.msrb.mxu2 %v2095_v56  ;;  %939 = vmatmul.bf16.gmra.mxu3 %v2754_v57  ;;  %v2366_v46 = vld [vmem:[#allocation5 + $0xe4] sm:$0xf]  ;;  %v1800_v47 = vld [vmem:[#allocation5 + $0xe8] sm:$0xf0]  ;;  %v2003_v55 = vor.u32 %v2416_v37, %v2000_v38  ;;  %v2764_v62 = vor.u32 %v2330_v42, %v1654_v41  ;;  %v2364_v4 = vld [vmem:[#allocation5 + $0xd4] sm:$0xf] }
  0x4d   :  { %1006 = vmatpush.bf16.msrb.mxu3 %v1715_v59  ;;  %v2382_v49 = vld [vmem:[#allocation5 + $0x164] sm:$0xf]  ;;  %v1864_v56 = vld [vmem:[#allocation5 + $0x168] sm:$0xf0]  ;;  %v1803_v1 = vor.u32 %v2366_v46, %v1800_v47  ;;  %v1792_v5 = vld [vmem:[#allocation5 + $0xd8] sm:$0xf0] }
  0x4e   :  { %950 = vmatpush.bf16.msrb.mxu0 %v1959_v60  ;;  %v2398_v59 = vld [vmem:[#allocation5 + $0x1e4] sm:$0xf]  ;;  %v1928_v60 = vld [vmem:[#allocation5 + $0x1e8] sm:$0xf0]  ;;  %v1867_v2 = vor.u32 %v2382_v49, %v1864_v56  ;;  %v1856_v8 = vld [vmem:[#allocation5 + $0x158] sm:$0xf0]  ;;  %v1795_v13 = vor.u32 %v2364_v4, %v1792_v5 }
  0x4f   :  { %969 = vmatpush.bf16.msrb.mxu1 %v2023_v0  ;;  %v2414_v63 = vld [vmem:[#allocation5 + $0x264] sm:$0xf]  ;;  %v1992_v0 = vld [vmem:[#allocation5 + $0x268] sm:$0xf0]  ;;  %v1931_v3 = vor.u32 %v2398_v59, %v1928_v60  ;;  %v2412_v11 = vld [vmem:[#allocation5 + $0x254] sm:$0xf] }
  0x50   :  { %988 = vmatpush.bf16.msrb.mxu2 %v2087_v6  ;;  %v2380_v6 = vld [vmem:[#allocation5 + $0x154] sm:$0xf]  ;;  %v1995_v7 = vor.u32 %v2414_v63, %v1992_v0  ;;  %v1984_v12 = vld [vmem:[#allocation5 + $0x258] sm:$0xf0]  ;;  %v2362_v16 = vld [vmem:[#allocation5 + $0xc4] sm:$0xf] }
  0x51   :  { %1007 = vmatpush.bf16.msrb.mxu3 %v1707_v9  ;;  %v2396_v9 = vld [vmem:[#allocation5 + $0x1d4] sm:$0xf]  ;;  %v1784_v17 = vld [vmem:[#allocation5 + $0xc8] sm:$0xf0]  ;;  %v2378_v18 = vld [vmem:[#allocation5 + $0x144] sm:$0xf]  ;;  %v1987_v19 = vor.u32 %v2412_v11, %v1984_v12 }
  0x52   :  { %951 = vmatpush.bf16.msrb.mxu0 %v1951_v10  ;;  %v1920_v10 = vld [vmem:[#allocation5 + $0x1d8] sm:$0xf0]  ;;  %v1848_v20 = vld [vmem:[#allocation5 + $0x148] sm:$0xf0]  ;;  %v2410_v23 = vld [vmem:[#allocation5 + $0x244] sm:$0xf] }
  0x53   :  { %970 = vmatpush.bf16.msrb.mxu1 %v2015_v14  ;;  %v1859_v14 = vor.u32 %v2380_v6, %v1856_v8  ;;  %v1923_v15 = vor.u32 %v2396_v9, %v1920_v10  ;;  %v1912_v22 = vld [vmem:[#allocation5 + $0x1c8] sm:$0xf0]  ;;  %v1674_v27 = vld [vmem:[#allocation2 + $0x48] sm:$0xf]  ;;  %v2336_v28 = vld [vmem:[#allocation2 + $0x60] sm:$0xf0] }
  0x54   :  { %989 = vmatpush.bf16.msrb.mxu2 %v2079_v21  ;;  %v2394_v21 = vld [vmem:[#allocation5 + $0x1c4] sm:$0xf]  ;;  %v1976_v24 = vld [vmem:[#allocation5 + $0x248] sm:$0xf0]  ;;  %v2360_v29 = vld [vmem:[#allocation5 + $0xb4] sm:$0xf]  ;;  %v2770_v56 = vor.u32 %v2336_v28, %v1674_v27 }
  0x55   :  { %1008 = vmatpush.bf16.msrb.mxu3 %v1699_v25  ;;  %v1787_v25 = vor.u32 %v2362_v16, %v1784_v17  ;;  %v2376_v31 = vld [vmem:[#allocation5 + $0x134] sm:$0xf]  ;;  %v2333_v33 = vld [vmem:[#allocation2 + $0x4c] sm:$0xf]  ;;  %v1676_v37 = vld [vmem:[#allocation2 + $0x64] sm:$0xf0] }
  0x56   :  { %952 = vmatpush.bf16.msrb.mxu0 %v1943_v26  ;;  %v1915_v26 = vor.u32 %v2394_v21, %v1912_v22  ;;  %v1840_v34 = vld [vmem:[#allocation5 + $0x138] sm:$0xf0]  ;;  %v2392_v35 = vld [vmem:[#allocation5 + $0x1b4] sm:$0xf]  ;;  %v1682_v40 = vld [vmem:[#allocation2 + $0x50] sm:$0xf]  ;;  %v2772_v0 = vor.u32 %v2333_v33, %v1676_v37 }
  0x57   :  { %971 = vmatpush.bf16.msrb.mxu1 %v2007_v30  ;;  %v1776_v30 = vld [vmem:[#allocation5 + $0xb8] sm:$0xf0]  ;;  %v2408_v38 = vld [vmem:[#allocation5 + $0x234] sm:$0xf]  ;;  %v1768_v47 = vld [vmem:[#allocation5 + $0xa8] sm:$0xf0] }
  0x58   :  { %990 = vmatpush.bf16.msrb.mxu2 %v2071_v39  ;;  %v1968_v39 = vld [vmem:[#allocation5 + $0x238] sm:$0xf0]  ;;  %v1779_v42 = vor.u32 %v2360_v29, %v1776_v30  ;;  %v2374_v49 = vld [vmem:[#allocation5 + $0x124] sm:$0xf]  ;;  %v1896_v63 = vld [vmem:[#allocation5 + $0x1a8] sm:$0xf0] }
  0x59   :  { %1009 = vmatpush.bf16.msrb.mxu3 %v1691_v43  ;;  %953 = vmatmul.bf16.vlgmr.msrb.gmra.mxu0 %v2760_v52  ;;  %v2337_v41 = vld [vmem:[#allocation2 + $0x68] sm:$0xf0]  ;;  %v2358_v43 = vld [vmem:[#allocation5 + $0xa4] sm:$0xf]  ;;  %v1971_v59 = vor.u32 %v2408_v38, %v1968_v39  ;;  %v2372_v9 = vld [vmem:[#allocation5 + $0x114] sm:$0xf] }
  0x5a   :  { %1021 = vmatpush.bf16.msra.mxu0 %v1811_v32  ;;  %972 = vmatmul.bf16.vlgmr.msrb.gmra.mxu1 %v2762_v61  ;;  %v1979_v32 = vor.u32 %v2410_v23, %v1976_v24  ;;  %v2390_v60 = vld [vmem:[#allocation5 + $0x1a4] sm:$0xf]  ;;  %v1771_v4 = vor.u32 %v2358_v43, %v1768_v47  ;;  %v1760_v8 = vld [vmem:[#allocation5 + $0x98] sm:$0xf0]  ;;  %v2388_v12 = vld [vmem:[#allocation5 + $0x194] sm:$0xf] }
  0x5b   :  { %1040 = vmatpush.bf16.msra.mxu1 %v1875_v36  ;;  %991 = vmatmul.bf16.vlgmr.msrb.gmra.mxu2 %v2764_v62  ;;  %v1904_v36 = vld [vmem:[#allocation5 + $0x1b8] sm:$0xf0]  ;;  %v1899_v6 = vor.u32 %v2390_v60, %v1896_v63  ;;  %v2354_v17 = vld [vmem:[#allocation5 + $0x84] sm:$0xf]  ;;  %v1816_v22 = vld [vmem:[#allocation5 + $0x108] sm:$0xf0] }
  0x5c   :  { %1059 = vmatpush.bf16.msra.mxu2 %v1939_v45  ;;  %1010 = vmatmul.bf16.vlgmr.msrb.gmra.mxu3 %v2736_v48  ;;  %v1851_v48 = vor.u32 %v2378_v18, %v1848_v20  ;;  %v1843_v45 = vor.u32 %v2376_v31, %v1840_v34  ;;  %v1907_v46 = vor.u32 %v2392_v35, %v1904_v36  ;;  %v1824_v11 = vld [vmem:[#allocation5 + $0x118] sm:$0xf0]  ;;  %v1752_v20 = vld [vmem:[#allocation5 + $0x88] sm:$0xf0]  ;;  %v2370_v21 = vld [vmem:[#allocation5 + $0x104] sm:$0xf] }
  0x5d   :  { %1078 = vmatpush.bf16.msra.mxu3 %v2003_v55  ;;  %v1832_v55 = vld [vmem:[#allocation5 + $0x128] sm:$0xf0]  ;;  %v1827_v18 = vor.u32 %v2372_v9, %v1824_v11  ;;  %v2386_v24 = vld [vmem:[#allocation5 + $0x184] sm:$0xf]  ;;  %v2432_v27 = vld [vmem:[#allocation5 + $0x2f4] sm:$0xf]  ;;  %v1819_v31 = vor.u32 %v2370_v21, %v1816_v22 }
  0x5e   :  { %1022 = vmatpush.bf16.msra.mxu0 %v1803_v1  ;;  %v2774_v1 = vor.u32 %v2337_v41, %v1682_v40  ;;  %v1835_v5 = vor.u32 %v2374_v49, %v1832_v55  ;;  %v2064_v28 = vld [vmem:[#allocation5 + $0x2f8] sm:$0xf0]  ;;  %v2448_v29 = vld [vmem:[#allocation5 + $0x374] sm:$0xf]  ;;  %v2430_v36 = vld [vmem:[#allocation5 + $0x2e4] sm:$0xf] }
  0x5f   :  { %1041 = vmatpush.bf16.msra.mxu1 %v1867_v2  ;;  %v2406_v2 = vld [vmem:[#allocation5 + $0x224] sm:$0xf]  ;;  %v2128_v30 = vld [vmem:[#allocation5 + $0x378] sm:$0xf0]  ;;  %v2067_v34 = vor.u32 %v2432_v27, %v2064_v28  ;;  %v2056_v37 = vld [vmem:[#allocation5 + $0x2e8] sm:$0xf0] }
  0x60   :  { %1060 = vmatpush.bf16.msra.mxu2 %v1931_v3  ;;  %v1960_v3 = vld [vmem:[#allocation5 + $0x228] sm:$0xf0]  ;;  %v2131_v35 = vor.u32 %v2448_v29, %v2128_v30  ;;  %v2446_v38 = vld [vmem:[#allocation5 + $0x364] sm:$0xf]  ;;  %v2059_v40 = vor.u32 %v2430_v36, %v2056_v37  ;;  %v2048_v43 = vld [vmem:[#allocation5 + $0x2d8] sm:$0xf0] }
  0x61   :  { %1079 = vmatpush.bf16.msra.mxu3 %v1995_v7  ;;  %v2356_v7 = vld [vmem:[#allocation5 + $0x94] sm:$0xf]  ;;  %v1963_v10 = vor.u32 %v2406_v2, %v1960_v3  ;;  %v2120_v39 = vld [vmem:[#allocation5 + $0x368] sm:$0xf0]  ;;  %v2426_v55 = vld [vmem:[#allocation5 + $0x2c4] sm:$0xf] }
  0x62   :  { %1023 = vmatpush.bf16.msra.mxu0 %v1795_v13  ;;  %v1888_v13 = vld [vmem:[#allocation5 + $0x198] sm:$0xf0]  ;;  %v1763_v16 = vor.u32 %v2356_v7, %v1760_v8  ;;  %v2123_v41 = vor.u32 %v2446_v38, %v2120_v39  ;;  %v2442_v60 = vld [vmem:[#allocation5 + $0x344] sm:$0xf]  ;;  %v2104_v63 = vld [vmem:[#allocation5 + $0x348] sm:$0xf0] }
  0x63   :  { %1042 = vmatpush.bf16.msra.mxu1 %v1859_v14  ;;  %v2404_v14 = vld [vmem:[#allocation5 + $0x214] sm:$0xf]  ;;  %v2024_v7 = vld [vmem:[#allocation5 + $0x2a8] sm:$0xf0]  ;;  %v2438_v8 = vld [vmem:[#allocation5 + $0x324] sm:$0xf] }
  0x64   :  { %1061 = vmatpush.bf16.msra.mxu2 %v1923_v15  ;;  %v1952_v15 = vld [vmem:[#allocation5 + $0x218] sm:$0xf0]  ;;  %v2424_v3 = vld [vmem:[#allocation5 + $0x2b4] sm:$0xf]  ;;  %v2088_v9 = vld [vmem:[#allocation5 + $0x328] sm:$0xf0] }
  0x65   :  { %1080 = vmatpush.bf16.msra.mxu3 %v1987_v19  ;;  %v1891_v19 = vor.u32 %v2388_v12, %v1888_v13  ;;  %v1955_v23 = vor.u32 %v2404_v14, %v1952_v15  ;;  %v2091_v11 = vor.u32 %v2438_v8, %v2088_v9  ;;  %v2420_v12 = vld [vmem:[#allocation5 + $0x294] sm:$0xf]  ;;  %v2016_v13 = vld [vmem:[#allocation5 + $0x298] sm:$0xf0]  ;;  %v2072_v21 = vld [vmem:[#allocation5 + $0x308] sm:$0xf0] }
  0x66   :  { %1024 = vmatpush.bf16.msra.mxu0 %v1787_v25  ;;  %v1880_v25 = vld [vmem:[#allocation5 + $0x188] sm:$0xf0]  ;;  %v2436_v14 = vld [vmem:[#allocation5 + $0x314] sm:$0xf]  ;;  %v2080_v15 = vld [vmem:[#allocation5 + $0x318] sm:$0xf0] }
  0x67   :  { %1043 = vmatpush.bf16.msra.mxu1 %v1851_v48  ;;  %v2402_v48 = vld [vmem:[#allocation5 + $0x204] sm:$0xf]  ;;  %v2460_v29 = vld [vmem:[#allocation8 + $0x54] sm:$0xf]  ;;  %v2176_v30 = vld [vmem:[#allocation8 + $0x58] sm:$0xf0] }
  0x68   :  { %1062 = vmatpush.bf16.msra.mxu2 %v1915_v26  ;;  %v1944_v26 = vld [vmem:[#allocation5 + $0x208] sm:$0xf0]  ;;  %v2462_v27 = vld [vmem:[#allocation8 + $0x64] sm:$0xf]  ;;  %s2674_s30 = smov [#allocation11]  }
  0x69   :  { %1081 = vmatpush.bf16.msra.mxu3 %v1979_v32  ;;  %958 = vmatmul.bf16.gmra.mxu0 %v2770_v56  ;;  %v1883_v32 = vor.u32 %v2386_v24, %v1880_v25  ;;  %v1947_v33 = vor.u32 %v2402_v48, %v1944_v26  ;;  %v2192_v24 = vld [vmem:[#allocation8 + $0x78] sm:$0xf0]  ;;  %v2182_v48 = vld [vmem:[#allocation8 + $0x60] sm:$0xf]  ;;  %v2463_v26 = vld [vmem:[#allocation8 + $0x64] sm:$0xf0] }
  0x6a   :  { %1025 = vmatpush.bf16.msra.mxu0 %v1779_v42  ;;  %977 = vmatmul.bf16.gmra.mxu1 %v2772_v0  ;;  %v2428_v42 = vld [vmem:[#allocation5 + $0x2d4] sm:$0xf]  ;;  %v2183_v28 = vor.u32 %v2463_v26, %v2182_v48  ;;  %v2168_v38 = vld [vmem:[#allocation8 + $0x48] sm:$0xf0]  ;;  %s1611_s8 = sshll.u32 %s2674_s30, 4  ;;  %s1612_s8 = int_to_ptr.vmem [resolvable:$true] %s1611_s8 }
  0x6b   :  { %1044 = vmatpush.bf16.msra.mxu1 %v1843_v45  ;;  %996 = vmatmul.bf16.gmra.mxu2 %v2774_v1  ;;  %v2444_v45 = vld [vmem:[#allocation5 + $0x354] sm:$0xf]  ;;  %v2051_v47 = vor.u32 %v2428_v42, %v2048_v43 }
  0x6c   :  { %1063 = vmatpush.bf16.msra.mxu2 %v1907_v46  ;;  %1015 = vmatmul.bf16.gmra.mxu3 %v2748_v44  ;;  %v1755_v44 = vor.u32 %v2354_v17, %v1752_v20  ;;  %v2112_v46 = vld [vmem:[#allocation5 + $0x358] sm:$0xf0]  ;;  %v2083_v17 = vor.u32 %v2436_v14, %v2080_v15  ;;  %v2434_v20 = vld [vmem:[#allocation5 + $0x304] sm:$0xf]  ;;  %v2456_v42 = vld [vmem:[#allocation8 + $0x34] sm:$0xf] }
  0x6d   :  { %1082 = vmatpush.bf16.msra.mxu3 %v1971_v59  ;;  %v2115_v49 = vor.u32 %v2444_v45, %v2112_v46  ;;  %v2040_v59 = vld [vmem:[#allocation5 + $0x2c8] sm:$0xf0]  ;;  %v2160_v45 = vld [vmem:[#allocation8 + $0x38] sm:$0xf0] }
  0x6e   :  { %1026 = vmatpush.bf16.msra.mxu0 %v1771_v4  ;;  %v2043_v2 = vor.u32 %v2426_v55, %v2040_v59  ;;  %v2032_v4 = vld [vmem:[#allocation5 + $0x2b8] sm:$0xf0]  ;;  %v2163_v46 = vor.u32 %v2456_v42, %v2160_v45  ;;  %v2150_v59 = vld [vmem:[#allocation8 + $0x20] sm:$0xf] }
  0x6f   :  { %1045 = vmatpush.bf16.msra.mxu1 %v1835_v5  ;;  %v2440_v5 = vld [vmem:[#allocation5 + $0x334] sm:$0xf]  ;;  %v2481_v42 = vld [vmem:[#allocation8 + $0xf4] sm:$0xf0] }
  0x70   :  { %1064 = vmatpush.bf16.msra.mxu2 %v1899_v6  ;;  %v2422_v6 = vld [vmem:[#allocation5 + $0x2a4] sm:$0xf] }
  0x71   :  { %1083 = vmatpush.bf16.msra.mxu3 %v1963_v10  ;;  %v2027_v10 = vor.u32 %v2422_v6, %v2024_v7  ;;  %v2144_v6 = vld [vmem:[#allocation8 + $0x18] sm:$0xf0] }
  0x72   :  { %1027 = vmatpush.bf16.msra.mxu0 %v1763_v16  ;;  %v2019_v16 = vor.u32 %v2420_v12, %v2016_v13  ;;  %v2451_v12 = vld [vmem:[#allocation8 + $0x4] sm:$0xf0]  ;;  %v2450_v13 = vld [vmem:[#allocation8 + $0x4] sm:$0xf] }
  0x73   :  { %1046 = vmatpush.bf16.msra.mxu1 %v1827_v18  ;;  %v2418_v18 = vld [vmem:[#allocation5 + $0x284] sm:$0xf] }
  0x74   :  { %1065 = vmatpush.bf16.msra.mxu2 %v1891_v19  ;;  %v2008_v19 = vld [vmem:[#allocation5 + $0x288] sm:$0xf0] }
  0x75   :  { %1084 = vmatpush.bf16.msra.mxu3 %v1955_v23  ;;  %v2011_v22 = vor.u32 %v2418_v18, %v2008_v19  ;;  %v2792_v18 = vld [vmem:[#allocation7] sm:$0x3] }
  0x76   :  { %1028 = vmatpush.bf16.msra.mxu0 %v1755_v44  ;;  %v2184_v44 = vld [vmem:[#allocation8 + $0x68] sm:$0xf0] }
  0x77   :  { %1047 = vmatpush.bf16.msra.mxu1 %v1819_v31  ;;  %v2179_v31 = vor.u32 %v2460_v29, %v2176_v30 }
  0x78   :  { %1066 = vmatpush.bf16.msra.mxu2 %v1883_v32 }
  0x79   :  { %1085 = vmatpush.bf16.msra.mxu3 %v1947_v33  ;;  %1029 = vmatmul.bf16.vlgmr.msra.gmra.mxu0 %v2738_v53  ;;  %v2107_v53 = vor.u32 %v2442_v60, %v2104_v63  ;;  %v2166_v33 = vld [vmem:[#allocation8 + $0x40] sm:$0xf]  ;;  %v2455_v60 = vld [vmem:[#allocation8 + $0x24] sm:$0xf0]  ;;  %v2454_v63 = vld [vmem:[#allocation8 + $0x24] sm:$0xf] }
  0x7a   :  { %1097 = vmatpush.bf16.msrb.mxu0 %v2067_v34  ;;  %1048 = vmatmul.bf16.vlgmr.msra.gmra.mxu1 %v2740_v54  ;;  %v2096_v54 = vld [vmem:[#allocation5 + $0x338] sm:$0xf0]  ;;  %v2459_v34 = vld [vmem:[#allocation8 + $0x44] sm:$0xf0] }
  0x7b   :  { %1116 = vmatpush.bf16.msrb.mxu1 %v2131_v35  ;;  %1067 = vmatmul.bf16.vlgmr.msra.gmra.mxu2 %v2742_v58  ;;  %v2035_v58 = vor.u32 %v2424_v3, %v2032_v4  ;;  %v2458_v35 = vld [vmem:[#allocation8 + $0x44] sm:$0xf]  ;;  %v2167_v37 = vor.u32 %v2459_v34, %v2166_v33  ;;  %v2152_v3 = vld [vmem:[#allocation8 + $0x28] sm:$0xf0] }
  0x7c   :  { %1086 = vmatmul.bf16.vlgmr.msra.gmra.mxu3 %v2760_v52  ;;  %v2099_v52 = vor.u32 %v2440_v5, %v2096_v54  ;;  %v2171_v39 = vor.u32 %v2458_v35, %v2168_v38  ;;  %v2155_v4 = vor.u32 %v2454_v63, %v2152_v3  ;;  %v2142_v5 = vld [vmem:[#allocation8 + $0x10] sm:$0xf]  ;;  %v2453_v54 = vld [vmem:[#allocation8 + $0x14] sm:$0xf0] }
  0x7e   :  { %1098 = vmatpush.bf16.msrb.mxu0 %v2059_v40  ;;  %v2158_v40 = vld [vmem:[#allocation8 + $0x30] sm:$0xf] }
  0x7f   :  { %1117 = vmatpush.bf16.msrb.mxu1 %v2123_v41  ;;  %v2457_v41 = vld [vmem:[#allocation8 + $0x34] sm:$0xf0] }
  0x80   :  { %v2159_v43 = vor.u32 %v2457_v41, %v2158_v40  ;;  %v2254_v41 = vld [vmem:[#allocation8 + $0xf0] sm:$0xf] }
  0x82   :  { %1099 = vmatpush.bf16.msrb.mxu0 %v2051_v47 }
  0x83   :  { %1118 = vmatpush.bf16.msrb.mxu1 %v2115_v49 }
  0x86   :  { %1100 = vmatpush.bf16.msrb.mxu0 %v2043_v2 }
  0x87   :  { %1119 = vmatpush.bf16.msrb.mxu1 %v2107_v53  ;;  %v2151_v53 = vor.u32 %v2455_v60, %v2150_v59 }
  0x89   :  { %1034 = vmatmul.bf16.gmra.mxu0 %v2750_v50  ;;  %v2075_v50 = vor.u32 %v2434_v20, %v2072_v21  ;;  %v233_v20 = vperm.slane %v2792_v18, 0 }
  0x8a   :  { %1101 = vmatpush.bf16.msrb.mxu0 %v2035_v58  ;;  %1053 = vmatmul.bf16.gmra.mxu1 %v2752_v51  ;;  %v2190_v51 = vld [vmem:[#allocation8 + $0x70] sm:$0xf]  ;;  %v2452_v58 = vld [vmem:[#allocation8 + $0x14] sm:$0xf] }
  0x8b   :  { %1120 = vmatpush.bf16.msrb.mxu1 %v2099_v52  ;;  %1072 = vmatmul.bf16.gmra.mxu2 %v2754_v57  ;;  %v2465_v57 = vld [vmem:[#allocation8 + $0x74] sm:$0xf0]  ;;  %v2143_v52 = vor.u32 %v2453_v54, %v2142_v5  ;;  %v2147_v7 = vor.u32 %v2452_v58, %v2144_v6  ;;  %v2478_v54 = vld [vmem:[#allocation8 + $0xe4] sm:$0xf]  ;;  %v2248_v58 = vld [vmem:[#allocation8 + $0xe8] sm:$0xf0] }
  0x8c   :  { %1091 = vmatmul.bf16.gmra.mxu3 %v2770_v56  ;;  %v2464_v56 = vld [vmem:[#allocation8 + $0x74] sm:$0xf]  ;;  %v2191_v23 = vor.u32 %v2465_v57, %v2190_v51 }
  0x8d   :  { %v2195_v25 = vor.u32 %v2464_v56, %v2192_v24 }
  0x8e   :  { %1102 = vmatpush.bf16.msrb.mxu0 %v2027_v10  ;;  %1345 = vmatpush.bf16.msrb.mxu2 %v2191_v23 }
  0x8f   :  { %1121 = vmatpush.bf16.msrb.mxu1 %v2091_v11  ;;  %v2134_v11 = vld [vmem:[#allocation8] sm:$0xf] }
  0x90   :  { %v2135_v15 = vor.u32 %v2451_v12, %v2134_v11  ;;  %v2238_v12 = vld [vmem:[#allocation8 + $0xd0] sm:$0xf] }
  0x92   :  { %1103 = vmatpush.bf16.msrb.mxu0 %v2019_v16  ;;  %1346 = vmatpush.bf16.msrb.mxu2 %v2183_v28  ;;  %v2136_v16 = vld [vmem:[#allocation8 + $0x8] sm:$0xf0] }
  0x93   :  { %1122 = vmatpush.bf16.msrb.mxu1 %v2083_v17  ;;  %v2139_v17 = vor.u32 %v2450_v13, %v2136_v16  ;;  %v2477_v13 = vld [vmem:[#allocation8 + $0xd4] sm:$0xf0] }
  0x94   :  { %v2239_v16 = vor.u32 %v2477_v13, %v2238_v12 }
  0x96   :  { %1104 = vmatpush.bf16.msrb.mxu0 %v2011_v22 }
  0x97   :  { %1123 = vmatpush.bf16.msrb.mxu1 %v2075_v50 }
  0x99   :  { %1105 = vmatmul.bf16.vlgmr.msrb.gmra.mxu0 %v2762_v61  ;;  %v2187_v61 = vor.u32 %v2462_v27, %v2184_v44 }
  0x9a   :  { %1124 = vmatmul.bf16.vlgmr.msrb.gmra.mxu1 %v2764_v62  ;;  %1383 = vmatpush.bf16.msra.mxu0 %v2195_v25  ;;  %v2174_v62 = vld [vmem:[#allocation8 + $0x50] sm:$0xf] }
  0x9e   :  { %1384 = vmatpush.bf16.msra.mxu0 %v2187_v61 }
  0xa2   :  { %1385 = vmatpush.bf16.msra.mxu0 %v2179_v31 }
  0xa6   :  { %1386 = vmatpush.bf16.msra.mxu0 %v2171_v39 }
  0xa9   :  { %1110 = vmatmul.bf16.gmra.mxu0 %v2772_v0  ;;  %v2461_v0 = vld [vmem:[#allocation8 + $0x54] sm:$0xf0] }
  0xaa   :  { %1129 = vmatmul.bf16.gmra.mxu1 %v2774_v1  ;;  %v2175_v1 = vor.u32 %v2461_v0, %v2174_v62  ;;  %1387 = vmatpush.bf16.msra.mxu0 %v2163_v46 }
  0xac   :  { %1347 = vmatpush.bf16.msrb.mxu2 %v2175_v1 }
  0xae   :  { %1388 = vmatpush.bf16.msra.mxu0 %v2155_v4 }
  0xb0   :  { %1348 = vmatpush.bf16.msrb.mxu2 %v2167_v37 }
  0xb2   :  { %1389 = vmatpush.bf16.msra.mxu0 %v2147_v7 }
  0xb4   :  { %1349 = vmatpush.bf16.msrb.mxu2 %v2159_v43  ;;  %v2480_v43 = vld [vmem:[#allocation8 + $0xf4] sm:$0xf] }
  0xb6   :  { %v878_v32 = vpop.f32.mrf.mxu0  ;;  %1390 = vmatpush.bf16.msra.mxu0 %v2139_v17  ;;  %v2240_v17 = vld [vmem:[#allocation8 + $0xd8] sm:$0xf0] }
  0xb7   :  { %v897_v36 = vpop.f32.mrf.mxu1  ;;  %v879_v51 = vadd.f32 %v878_v32, %v233_v20 }
  0xb8   :  { %1350 = vmatpush.bf16.msrb.mxu2 %v2151_v53  ;;  %v2479_v53 = vld [vmem:[#allocation8 + $0xe4] sm:$0xf0] }
  0xb9   :  { %v898_v23 = vadd.f32 %v897_v36, %v879_v51 }
  0xbc   :  { %1351 = vmatpush.bf16.msrb.mxu2 %v2143_v52  ;;  %v2251_v52 = vor.u32 %v2478_v54, %v2248_v58  ;;  %v234_v54 = vperm.slane %v2792_v18, 1 }
  0xbe   :  { %v916_v47 = vpop.f32.mrf.mxu2  ;;  %v880_v49 = vpop.f32.mrf.mxu0 }
  0xbf   :  { %v935_v55 = vpop.f32.mrf.mxu3  ;;  %v899_v2 = vpop.f32.mrf.mxu1  ;;  %v881_v57 = vadd.f32 %v880_v49, %v233_v20  ;;  %v917_v48 = vadd.f32 %v916_v47, %v898_v23  ;;  %v2255_v47 = vor.u32 %v2481_v42, %v2254_v41  ;;  %v2256_v49 = vld [vmem:[#allocation8 + $0xf8] sm:$0xf0]  ;;  %v2206_v42 = vld [vmem:[#allocation8 + $0x90] sm:$0xf] }
  0xc0   :  { %1352 = vmatpush.bf16.msrb.mxu2 %v2135_v15  ;;  %v2259_v63 = vor.u32 %v2480_v43, %v2256_v49  ;;  %v2469_v43 = vld [vmem:[#allocation8 + $0x94] sm:$0xf0]  ;;  %v2208_v49 = vld [vmem:[#allocation8 + $0x98] sm:$0xf0] }
  0xc1   :  { %v900_v26 = vadd.f32 %v899_v2, %v881_v57  ;;  %v936_v44 = vadd.f32 %v935_v55, %v917_v48  ;;  %1364 = vmatpush.bf16.msrb.mxu3 %v2255_v47  ;;  %v2246_v2 = vld [vmem:[#allocation8 + $0xe0] sm:$0xf]  ;;  %v2474_v57 = vld [vmem:[#allocation8 + $0xc4] sm:$0xf]  ;;  %v2207_v47 = vor.u32 %v2469_v43, %v2206_v42 }
  0xc2   :  { %1402 = vmatpush.bf16.msra.mxu1 %v2259_v63  ;;  %v2247_v5 = vor.u32 %v2479_v53, %v2246_v2  ;;  %v2467_v63 = vld [vmem:[#allocation8 + $0x84] sm:$0xf0]  ;;  %v2466_v2 = vld [vmem:[#allocation8 + $0x84] sm:$0xf] }
  0xc5   :  { %1365 = vmatpush.bf16.msrb.mxu3 %v2247_v5 }
  0xc6   :  { %v918_v8 = vpop.f32.mrf.mxu2  ;;  %v883_v9 = vpop.f32.mrf.mxu0  ;;  %1403 = vmatpush.bf16.msra.mxu1 %v2251_v52 }
  0xc7   :  { %v937_v10 = vpop.f32.mrf.mxu3  ;;  %v902_v14 = vpop.f32.mrf.mxu1  ;;  %v919_v27 = vadd.f32 %v918_v8, %v900_v26  ;;  %v884_v31 = vadd.f32 %v883_v9, %v233_v20 }
  0xc9   :  { %v938_v62 = vadd.f32 %v937_v10, %v919_v27  ;;  %v903_v36 = vadd.f32 %v902_v14, %v884_v31  ;;  %v2476_v14 = vld [vmem:[#allocation8 + $0xd4] sm:$0xf]  ;;  %1366 = vmatpush.bf16.msrb.mxu3 %v2239_v16 }
  0xce   :  { %v921_v19 = vpop.f32.mrf.mxu2  ;;  %v885_v21 = vpop.f32.mrf.mxu0 }
  0xcf   :  { %v904_v22 = vpop.f32.mrf.mxu1  ;;  %v940_v50 = vpop.f32.mrf.mxu3  ;;  %v886_v34 = vadd.f32 %v885_v21, %v233_v20  ;;  %v922_v45 = vadd.f32 %v921_v19, %v903_v36  ;;  %v2243_v20 = vor.u32 %v2476_v14, %v2240_v17  ;;  %v2230_v21 = vld [vmem:[#allocation8 + $0xc0] sm:$0xf]  ;;  %v2470_v36 = vld [vmem:[#allocation8 + $0xa4] sm:$0xf] }
  0xd1   :  { %v905_v55 = vadd.f32 %v904_v22, %v886_v34  ;;  %v941_v6 = vadd.f32 %v940_v50, %v922_v45  ;;  %v2475_v22 = vld [vmem:[#allocation8 + $0xc4] sm:$0xf0]  ;;  %1404 = vmatpush.bf16.msra.mxu1 %v2243_v20  ;;  %v2468_v45 = vld [vmem:[#allocation8 + $0x94] sm:$0xf] }
  0xd2   :  { %v2231_v51 = vor.u32 %v2475_v22, %v2230_v21 }
  0xd4   :  { %1367 = vmatpush.bf16.msrb.mxu3 %v2231_v51 }
  0xd6   :  { %v923_v56 = vpop.f32.mrf.mxu2  ;;  %v954_v24 = vpop.f32.mrf.mxu0 }
  0xd7   :  { %v973_v25 = vpop.f32.mrf.mxu1  ;;  %v942_v28 = vpop.f32.mrf.mxu3  ;;  %v955_v0 = vadd.f32 %v954_v24, %v936_v44  ;;  %v924_v3 = vadd.f32 %v923_v56, %v905_v55  ;;  %v2232_v56 = vld [vmem:[#allocation8 + $0xc8] sm:$0xf0]  ;;  %v2473_v44 = vld [vmem:[#allocation8 + $0xb4] sm:$0xf0]  ;;  %v2211_v55 = vor.u32 %v2468_v45, %v2208_v49 }
  0xd8   :  { %v2235_v23 = vor.u32 %v2474_v57, %v2232_v56  ;;  %v2497_v49 = vld [vmem:[#allocation10 + $0x78] sm:$0xff] }
  0xd9   :  { %v974_v33 = vadd.f32 %v973_v25, %v955_v0  ;;  %v943_v8 = vadd.f32 %v942_v28, %v924_v3  ;;  %v2222_v28 = vld [vmem:[#allocation8 + $0xb0] sm:$0xf]  ;;  %v2200_v3 = vld [vmem:[#allocation8 + $0x88] sm:$0xf0] }
  0xda   :  { %1405 = vmatpush.bf16.msra.mxu1 %v2235_v23  ;;  %v2223_v0 = vor.u32 %v2473_v44, %v2222_v28 }
  0xdc   :  { %1368 = vmatpush.bf16.msrb.mxu3 %v2223_v0 }
  0xde   :  { %v992_v61 = vpop.f32.mrf.mxu2  ;;  %v956_v29 = vpop.f32.mrf.mxu0 }
  0xdf   :  { %v975_v1 = vpop.f32.mrf.mxu1  ;;  %v957_v30 = vadd.f32 %v956_v29, %v938_v62  ;;  %v993_v32 = vadd.f32 %v992_v61, %v974_v33  ;;  %v2795_v37 = vpop.f32.mrf.mxu3  ;;  %v2472_v61 = vld [vmem:[#allocation8 + $0xb4] sm:$0xf]  ;;  %v2224_v29 = vld [vmem:[#allocation8 + $0xb8] sm:$0xf0] }
  0xe0   :  { %v2227_v33 = vor.u32 %v2472_v61, %v2224_v29 }
  0xe1   :  { %v976_v35 = vadd.f32 %v975_v1, %v957_v30  ;;  %v1135_v59 = vmax.f32 %v993_v32, 0.0  ;;  %v2214_v32 = vld [vmem:[#allocation8 + $0xa0] sm:$0xf] }
  0xe2   :  { %1406 = vmatpush.bf16.msra.mxu1 %v2227_v33 }
  0xe6   :  { %v994_v38 = vpop.f32.mrf.mxu2  ;;  %v959_v40 = vpop.f32.mrf.mxu0 }
  0xe7   :  { %v995_v39 = vadd.f32 %v994_v38, %v976_v35  ;;  %v978_v46 = vpop.f32.mrf.mxu1  ;;  %v960_v9 = vadd.f32 %v959_v40, %v941_v6  ;;  %v2797_v10 = vpop.f32.mrf.mxu3  ;;  %v2471_v35 = vld [vmem:[#allocation8 + $0xa4] sm:$0xf0]  ;;  %v1012_v6 = vadd.f32 %v2795_v37, %v234_v54 }
  0xe8   :  { %v2215_v38 = vor.u32 %v2471_v35, %v2214_v32  ;;  %v1014_v12 = vadd.f32 %v2797_v10, %v234_v54 }
  0xe9   :  { %v1137_v60 = vmax.f32 %v995_v39, 0.0  ;;  %v979_v50 = vadd.f32 %v978_v46, %v960_v9  ;;  %v2216_v39 = vld [vmem:[#allocation8 + $0xa8] sm:$0xf0] }
  0xea   :  { %v2219_v40 = vor.u32 %v2470_v36, %v2216_v39  ;;  %1369 = vmatpush.bf16.msrb.mxu3 %v2215_v38 }
  0xeb   :  { %v1143_v4 = vpack.c.bf16 %v1137_v60, %v1135_v59  ;;  %v2198_v60 = vld [vmem:[#allocation8 + $0x80] sm:$0xf] }
  0xec   :  { %1407 = vmatpush.bf16.msra.mxu1 %v2219_v40  ;;  %v2199_v53 = vor.u32 %v2467_v63, %v2198_v60  ;;  %v2488_v60 = vld [vmem:[#allocation10 + $0x30] sm:$0xff]  ;;  %v2495_v63 = vld [vmem:[#allocation10 + $0x68] sm:$0xff] }
  0xed   :  { %1353 = vmatmul.bf16.vlgmr.msrb.gmra.mxu2 %v1143_v4  ;;  %1391 = vmatmul.bf16.vlgmr.msra.gmra.mxu0 %v1143_v4  ;;  %v2203_v4 = vor.u32 %v2466_v2, %v2200_v3  ;;  %v2487_v2 = vld [vmem:[#allocation10 + $0x28] sm:$0xff]  ;;  %v2493_v3 = vld [vmem:[#allocation10 + $0x58] sm:$0xff] }
  0xee   :  { %v997_v7 = vpop.f32.mrf.mxu2  ;;  %v961_v11 = vpop.f32.mrf.mxu0  ;;  %1370 = vmatpush.bf16.msrb.mxu3 %v2207_v47 }
  0xef   :  { %v980_v15 = vpop.f32.mrf.mxu1  ;;  %v962_v19 = vadd.f32 %v961_v11, %v943_v8  ;;  %v998_v24 = vadd.f32 %v997_v7, %v979_v50  ;;  %v1016_v30 = vpop.f32.mrf.mxu3 }
  0xf0   :  { %1408 = vmatpush.bf16.msra.mxu1 %v2211_v55  ;;  %v1017_v50 = vadd.f32 %v1016_v30, %v234_v54  ;;  %v2489_v55 = vld [vmem:[#allocation10 + $0x38] sm:$0xff] }
  0xf1   :  { %v981_v25 = vadd.f32 %v980_v15, %v962_v19  ;;  %v1139_v1 = vmax.f32 %v998_v24, 0.0  ;;  %1565 = vmatpush.bf16.msra.mxu2 %v2489_v55 }
  0xf2   :  { %1371 = vmatpush.bf16.msrb.mxu3 %v2199_v53  ;;  %v2494_v53 = vld [vmem:[#allocation10 + $0x60] sm:$0xff] }
  0xf4   :  { %1409 = vmatpush.bf16.msra.mxu1 %v2203_v4  ;;  %v2486_v4 = vld [vmem:[#allocation10 + $0x20] sm:$0xff] }
  0xf5   :  { %1566 = vmatpush.bf16.msra.mxu2 %v2488_v60 }
  0xf6   :  { %v999_v48 = vpop.f32.mrf.mxu2  ;;  %v1030_v27 = vpop.f32.mrf.mxu0  ;;  %1584 = vmatpush.bf16.msra.mxu3 %v2497_v49  ;;  %v2510_v49 = vld [vmem:[%s2820_s6] ss:$0 sm:$0xff]  ;;  %s1613_s6 = sshll.u32 %s2821_s7, 4  ;;  %s1614_s6 = int_to_ptr.hbm [resolvable:$true] %s1613_s6 }
  0xf7   :  { %v1000_v26 = vadd.f32 %v999_v48, %v981_v25  ;;  %v1049_v62 = vpop.f32.mrf.mxu1  ;;  %v1018_v59 = vpop.f32.mrf.mxu3  ;;  %v1031_v9 = vadd.f32 %v1030_v27, %v1012_v6  ;;  %v2490_v6 = vld [vmem:[#allocation10 + $0x40] sm:$0xff] }
  0xf9   :  { %v1141_v31 = vmax.f32 %v1000_v26, 0.0  ;;  %v1050_v14 = vadd.f32 %v1049_v62, %v1031_v9  ;;  %v1019_v26 = vadd.f32 %v1018_v59, %v234_v54  ;;  %v2496_v59 = vld [vmem:[#allocation10 + $0x70] sm:$0xff]  ;;  %1567 = vmatpush.bf16.msra.mxu2 %v2487_v2  ;;  %v2485_v54 = vld [vmem:[#allocation10 + $0x18] sm:$0xff] }
  0xfa   :  { %1585 = vmatpush.bf16.msra.mxu3 %v2496_v59 }
  0xfb   :  { %v1145_v34 = vpack.c.bf16 %v1141_v31, %v1139_v1 }
  0xfd   :  { %1358 = vmatmul.bf16.gmra.mxu2 %v1145_v34  ;;  %1396 = vmatmul.bf16.gmra.mxu0 %v1145_v34 }
  0xfe   :  { %v1032_v41 = vpop.f32.mrf.mxu0  ;;  %v1068_v52 = vpop.f32.mrf.mxu2  ;;  %1586 = vmatpush.bf16.msra.mxu3 %v2495_v63  ;;  %1568 = vmatpush.bf16.msra.mxu2 %v2486_v4 }
  0xff   :  { %v1051_v46 = vpop.f32.mrf.mxu1  ;;  %v1087_v7 = vpop.f32.mrf.mxu3  ;;  %v1033_v15 = vadd.f32 %v1032_v41, %v1014_v12  ;;  %v1069_v16 = vadd.f32 %v1068_v52, %v1050_v14  ;;  %v2484_v52 = vld [vmem:[#allocation10 + $0x10] sm:$0xff]  ;;  %v1179_v12 = vld [vmem:[%s2818_s4] sm:$0x3] }
 0x101   :  { %v1052_v20 = vadd.f32 %v1051_v46, %v1033_v15  ;;  %v1088_v22 = vadd.f32 %v1087_v7, %v1069_v16  ;;  %v2483_v7 = vld [vmem:[#allocation10 + $0x8] sm:$0xff]  ;;  %v1182_v15 = vperm.slane %v1179_v12, 1 }
 0x102   :  { %1587 = vmatpush.bf16.msra.mxu3 %v2494_v53  ;;  %1569 = vmatpush.bf16.msra.mxu2 %v2485_v54 }
 0x106   :  { %v1035_v5 = vpop.f32.mrf.mxu0  ;;  %v1070_v13 = vpop.f32.mrf.mxu2  ;;  %1588 = vmatpush.bf16.msra.mxu3 %v2493_v3  ;;  %1570 = vmatpush.bf16.msra.mxu2 %v2484_v52 }
 0x107   :  { %v1054_v58 = vpop.f32.mrf.mxu1  ;;  %v1089_v17 = vpop.f32.mrf.mxu3  ;;  %v1071_v18 = vadd.f32 %v1070_v13, %v1052_v20  ;;  %v1036_v23 = vadd.f32 %v1035_v5, %v1017_v50  ;;  %v2492_v5 = vld [vmem:[#allocation10 + $0x50] sm:$0xff]  ;;  %v1181_v20 = vperm.slane %v1179_v12, 0 }
 0x109   :  { %v1090_v37 = vadd.f32 %v1089_v17, %v1071_v18  ;;  %v1055_v28 = vadd.f32 %v1054_v58, %v1036_v23  ;;  %v2491_v58 = vld [vmem:[#allocation10 + $0x48] sm:$0xff] }
 0x10a   :  { %1589 = vmatpush.bf16.msra.mxu3 %v2492_v5  ;;  %1571 = vmatpush.bf16.msra.mxu2 %v2483_v7 }
 0x10e   :  { %v1037_v8 = vpop.f32.mrf.mxu0  ;;  %v1073_v57 = vpop.f32.mrf.mxu2  ;;  %1590 = vmatpush.bf16.msra.mxu3 %v2491_v58 }
 0x10f   :  { %v1056_v11 = vpop.f32.mrf.mxu1  ;;  %v1092_v10 = vpop.f32.mrf.mxu3  ;;  %v1038_v44 = vadd.f32 %v1037_v8, %v1019_v26  ;;  %v1074_v0 = vadd.f32 %v1073_v57, %v1055_v28  ;;  %v2482_v8 = vld [vmem:[#allocation10] sm:$0xff] }
 0x110   :  { %1572 = vmatpush.bf16.msra.mxu2 %v2482_v8 }
 0x111   :  { %v1057_v30 = vadd.f32 %v1056_v11, %v1038_v44  ;;  %v1093_v34 = vadd.f32 %v1092_v10, %v1074_v0 }
 0x112   :  { %1591 = vmatpush.bf16.msra.mxu3 %v2490_v6 }
 0x116   :  { %v1106_v19 = vpop.f32.mrf.mxu0  ;;  %v1075_v1 = vpop.f32.mrf.mxu2 }
 0x117   :  { %v1125_v21 = vpop.f32.mrf.mxu1  ;;  %v1107_v51 = vadd.f32 %v1106_v19, %v1088_v22  ;;  %v1076_v32 = vadd.f32 %v1075_v1, %v1057_v30  ;;  %v1094_v35 = vpop.f32.mrf.mxu3 }
 0x119   :  { %v1126_v24 = vadd.f32 %v1125_v21, %v1107_v51  ;;  %v1095_v38 = vadd.f32 %v1094_v35, %v1076_v32 }
 0x11b   :  { %v1136_v61 = vmax.f32 %v1126_v24, 0.0 }
 0x11e   :  { %v1108_v56 = vpop.f32.mrf.mxu0 }
 0x11f   :  { %v1109_v25 = vadd.f32 %v1108_v56, %v1090_v37  ;;  %v1127_v48 = vpop.f32.mrf.mxu1 }
 0x121   :  { %v1128_v27 = vadd.f32 %v1127_v48, %v1109_v25 }
 0x123   :  { %v1138_v62 = vmax.f32 %v1128_v27, 0.0 }
 0x125   :  { %v1144_v29 = vpack.c.bf16 %v1138_v62, %v1136_v61 }
 0x126   :  { %v1111_v31 = vpop.f32.mrf.mxu0 }
 0x127   :  { %v1130_v33 = vpop.f32.mrf.mxu1  ;;  %1372 = vmatmul.bf16.vlgmr.msrb.gmra.mxu3 %v1144_v29  ;;  %1410 = vmatmul.bf16.vlgmr.msra.gmra.mxu1 %v1144_v29  ;;  %v1112_v36 = vadd.f32 %v1111_v31, %v1093_v34 }
 0x129   :  { %v1131_v40 = vadd.f32 %v1130_v33, %v1112_v36 }
 0x12b   :  { %v1140_v45 = vmax.f32 %v1131_v40, 0.0 }
 0x12e   :  { %v1113_v39 = vpop.f32.mrf.mxu0 }
 0x12f   :  { %v1114_v41 = vadd.f32 %v1113_v39, %v1095_v38  ;;  %v1132_v42 = vpop.f32.mrf.mxu1 }
 0x131   :  { %v1133_v43 = vadd.f32 %v1132_v42, %v1114_v41 }
 0x133   :  { %v1142_v46 = vmax.f32 %v1133_v43, 0.0 }
 0x135   :  { %v1146_v47 = vpack.c.bf16 %v1142_v46, %v1140_v45 }
 0x137   :  { %1377 = vmatmul.bf16.gmra.mxu3 %v1146_v47  ;;  %1415 = vmatmul.bf16.gmra.mxu1 %v1146_v47 }
 0x16a   :  { %v1392_v9 = vpop.f32.mrf.mxu0 }
 0x16b   :  { %v1393_v16 = vadd.f32 %v1392_v9, %v1182_v15 }
 0x170   :  { %v1354_v11 = vpop.f32.mrf.mxu2 }
 0x171   :  { %v1355_v57 = vadd.f32 %v1354_v11, %v1181_v20 }
 0x172   :  { %v1394_v13 = vpop.f32.mrf.mxu0 }
 0x173   :  { %v1395_v21 = vadd.f32 %v1394_v13, %v1182_v15 }
 0x178   :  { %v1356_v17 = vpop.f32.mrf.mxu2 }
 0x179   :  { %v1357_v23 = vadd.f32 %v1356_v17, %v1181_v20 }
 0x17a   :  { %v1397_v51 = vpop.f32.mrf.mxu0 }
 0x17b   :  { %v1398_v0 = vadd.f32 %v1397_v51, %v1182_v15 }
 0x180   :  { %v1359_v26 = vpop.f32.mrf.mxu2 }
 0x181   :  { %v1360_v32 = vadd.f32 %v1359_v26, %v1181_v20 }
 0x182   :  { %v1399_v62 = vpop.f32.mrf.mxu0 }
 0x183   :  { %v1400_v1 = vadd.f32 %v1399_v62, %v1182_v15 }
 0x188   :  { %v1361_v34 = vpop.f32.mrf.mxu2 }
 0x189   :  { %v1362_v38 = vadd.f32 %v1361_v34, %v1181_v20 }
 0x1a4   :  { %v1411_v14 = vpop.f32.mrf.mxu1 }
 0x1a5   :  { %v1412_v22 = vadd.f32 %v1411_v14, %v1393_v16 }
 0x1a7   :  { %v1422_v37 = vmax.f32 %v1412_v22, 0.0 }
 0x1aa   :  { %v1373_v19 = vpop.f32.mrf.mxu3 }
 0x1ab   :  { %v1374_v24 = vadd.f32 %v1373_v19, %v1355_v57 }
 0x1ac   :  { %v1413_v18 = vpop.f32.mrf.mxu1 }
 0x1ad   :  { %v1414_v50 = vadd.f32 %v1413_v18, %v1395_v21  ;;  %v1421_v28 = vmax.f32 %v1374_v24, 0.0 }
 0x1af   :  { %v1424_v56 = vmax.f32 %v1414_v50, 0.0 }
 0x1b1   :  { %v1430_v25 = vpack.c.bf16 %v1424_v56, %v1422_v37 }
 0x1b2   :  { %v1375_v48 = vpop.f32.mrf.mxu3 }
 0x1b3   :  { %v1376_v10 = vadd.f32 %v1375_v48, %v1357_v23  ;;  %1592 = vmatmul.bf16.vlgmr.msra.gmra.mxu3 %v1430_v25 }
 0x1b4   :  { %v1416_v27 = vpop.f32.mrf.mxu1 }
 0x1b5   :  { %v1423_v44 = vmax.f32 %v1376_v10, 0.0  ;;  %v1417_v31 = vadd.f32 %v1416_v27, %v1398_v0 }
 0x1b7   :  { %v1429_v61 = vpack.c.bf16 %v1423_v44, %v1421_v28  ;;  %v1426_v35 = vmax.f32 %v1417_v31, 0.0 }
 0x1b9   :  { %1573 = vmatmul.bf16.vlgmr.msra.gmra.mxu2 %v1429_v61 }
 0x1ba   :  { %v1378_v29 = vpop.f32.mrf.mxu3 }
 0x1bb   :  { %v1379_v39 = vadd.f32 %v1378_v29, %v1360_v32 }
 0x1bc   :  { %v1418_v30 = vpop.f32.mrf.mxu1 }
 0x1bd   :  { %v1419_v33 = vadd.f32 %v1418_v30, %v1400_v1  ;;  %v1425_v43 = vmax.f32 %v1379_v39, 0.0 }
 0x1bf   :  { %v1428_v36 = vmax.f32 %v1419_v33, 0.0 }
 0x1c1   :  { %v1432_v40 = vpack.c.bf16 %v1428_v36, %v1426_v35 }
 0x1c2   :  { %v1380_v41 = vpop.f32.mrf.mxu3 }
 0x1c3   :  { %v1381_v42 = vadd.f32 %v1380_v41, %v1362_v38  ;;  %1597 = vmatmul.bf16.gmra.mxu3 %v1432_v40 }
 0x1c5   :  { %v1427_v45 = vmax.f32 %v1381_v42, 0.0 }
 0x1c7   :  { %v1431_v46 = vpack.c.bf16 %v1427_v45, %v1425_v43 }
 0x1c9   :  { %1578 = vmatmul.bf16.gmra.mxu2 %v1431_v46 }
 0x236   :  { %v1593_v47 = vpop.f32.mrf.mxu3 }
 0x23c   :  { %v1574_v55 = vpop.f32.mrf.mxu2 }
 0x23d   :  { %v1575_v59 = vadd.f32 %v2510_v49, %v1574_v55 }
 0x23e   :  { %v1595_v63 = vpop.f32.mrf.mxu3 }
 0x23f   :  { %v1594_v60 = vadd.f32 %v1593_v47, %v1575_v59 }
 0x241   :  { %1603 = vst [vmem:[#allocation11] sm:$0xff] %v1594_v60 }
 0x244   :  { %v1576_v2 = vpop.f32.mrf.mxu2 }
 0x245   :  { %v1577_v53 = vadd.f32 %v2510_v49, %v1576_v2 }
 0x246   :  { %v1598_v4 = vpop.f32.mrf.mxu3 }
 0x247   :  { %v1596_v3 = vadd.f32 %v1595_v63, %v1577_v53 }
 0x249   :  { %1604 = vst [vmem:[#allocation11 + $0x8] sm:$0xff] %v1596_v3 }
 0x24c   :  { %v1579_v5 = vpop.f32.mrf.mxu2 }
 0x24d   :  { %v1580_v54 = vadd.f32 %v2510_v49, %v1579_v5 }
 0x24e   :  { %v1600_v7 = vpop.f32.mrf.mxu3 }
 0x24f   :  { %v1599_v58 = vadd.f32 %v1598_v4, %v1580_v54 }
 0x251   :  { %1605 = vst [vmem:[#allocation11 + $0x10] sm:$0xff] %v1599_v58 }
 0x254   :  { %v1581_v52 = vpop.f32.mrf.mxu2 }
 0x255   :  { %v1582_v6 = vadd.f32 %v2510_v49, %v1581_v52 }
 0x257   :  { %v1601_v8 = vadd.f32 %v1600_v7, %v1582_v6 }
 0x259   :  { %1606 = vst [vmem:[#allocation11 + $0x18] sm:$0xff] %v1601_v8 }
 0x25a   :  { %1619 = dma.vmem_to_hbm [thread:$0]  %s1612_s8, 512, %s1614_s6, [#allocation4], %s2664_s9, %s2664_s9, %s2665_s10  }
 0x25b   :  { %2661 = dma.done.wait [#allocation4], 512  }
 0x25c   :  { %2662 = vsyncadd [#allocation4], 4294966784 }
 0x25d   :  { %1624 = vsyncpa [#allocation3], 1 }
 0x25e   :  { %1625 = vsyncpa [#allocation6], 1 }
 0x25f   :  { %1626 = vsyncpa [#allocation9], 1 }
 0x260   :  { %1627 = vsyncpa [#allocation4], 1 }

</bundles_post_ra>
